<compile_context>
chip_gen: v6e
topology: v6e:2x2x1
jax: 0.10.0
libtpu: 0.0.40
codegen_flags: <defaults>
</compile_context>

<pallas_src>
import functools

import jax
import jax.numpy as jnp
from jax.experimental import pallas as pl
from jax.experimental.pallas import tpu as pltpu

_LANE = 128
_SUBLANE = 8
_MIB = 1024 * 1024


def _round_up(x, m):
    return (x + m - 1) // m * m


def _cdiv(a, b):
    return (a + b - 1) // b


def _vmem_budget_bytes():
    """~85% of physical VMEM (~108 MiB on v5e/v6e, ~54 MiB per-TC on v7x)."""
    try:
        cap = int(pltpu.get_tpu_info().vmem_capacity_bytes)
    except Exception:
        cap = 64 * _MIB  # conservative default (v7x per-TensorCore VMEM)
    return int(0.85 * cap)


# --------------------------------------------------------------------------- #
# Parameter init / one-time prep
# --------------------------------------------------------------------------- #
def init_mlp_params(key, input_dim, hidden_dim, output_dim, num_layers):
    """nn.Linear-shaped f32 params: weight (out, in), bias (out,)."""
    h = [hidden_dim] * (num_layers - 1)
    in_dims = [input_dim] + h
    out_dims = h + [output_dim]
    params = []
    for n_in, n_out in zip(in_dims, out_dims):
        key, kw, kb = jax.random.split(key, 3)
        bound = 1.0 / jnp.sqrt(jnp.asarray(n_in, jnp.float32))
        w = jax.random.uniform(kw, (n_out, n_in), jnp.float32, -bound, bound)
        b = jax.random.uniform(kb, (n_out,), jnp.float32, -bound, bound)
        params.append((w, b))
    return params


def prepare_mlp_params(params):
    """One-time prep: transpose to (in, out), zero-pad feature dims to x128 so
    every matmul / store is lane-dense, and store weights in bf16 (MXU-native;
    halves resident VMEM and HBM weight traffic). Biases stay f32.
    Zero padding is exact: padded inputs hit zero weight rows, padded hidden
    units get zero weight+bias (ReLU(0)=0) and zero rows in the next weight,
    and padded output columns are sliced off in the wrapper."""
    prepped = []
    for w, b in params:
        n_out, n_in = w.shape
        k_pad = _round_up(n_in, _LANE)
        n_pad = _round_up(n_out, _LANE)
        w_t = (jnp.zeros((k_pad, n_pad), jnp.bfloat16)
               .at[:n_in, :n_out].set(w.T.astype(jnp.bfloat16)))
        b_p = jnp.zeros((1, n_pad), jnp.float32).at[0, :n_out].set(b)
        prepped.append((w_t, b_p))
    return prepped


# --------------------------------------------------------------------------- #
# Kernels
# --------------------------------------------------------------------------- #
def _mlp_fused_kernel(x_ref, *refs, num_layers):
    """Whole MLP on one (tm, D_in_pad) row tile; all weights resident in VMEM.
    refs = (w0, b0, w1, b1, ..., o_ref)."""
    o_ref = refs[-1]
    wb = refs[:-1]
    h = x_ref[...]                        # f32 row tile
    for layer in range(num_layers):
        w = wb[2 * layer][...]            # (K_pad, N_pad) bf16, resident
        b = wb[2 * layer + 1][...]        # (1, N_pad) f32
        # bf16 x bf16 matmul on the MXU with f32 accumulate; bias/ReLU in f32.
        h = jnp.dot(h.astype(jnp.bfloat16), w,
                    preferred_element_type=jnp.float32) + b
        if layer < num_layers - 1:
            h = jnp.maximum(h, 0.0)
    o_ref[...] = h.astype(o_ref.dtype)


def _linear_tiled_kernel(x_ref, w_ref, b_ref, o_ref, acc_ref, *, apply_relu):
    """One K/N-tiled Linear (+ optional ReLU) step with a VMEM accumulator."""
    @pl.when(pl.program_id(2) == 0)
    def _():
        acc_ref[...] = jnp.zeros_like(acc_ref)

    acc_ref[...] += jnp.dot(x_ref[...].astype(jnp.bfloat16), w_ref[...],
                            preferred_element_type=jnp.float32)

    @pl.when(pl.program_id(2) == pl.num_programs(2) - 1)
    def _():
        r = acc_ref[...] + b_ref[...]
        if apply_relu:
            r = jnp.maximum(r, 0.0)
        o_ref[...] = r.astype(o_ref.dtype)


# --------------------------------------------------------------------------- #
# Tile selection
# --------------------------------------------------------------------------- #
def _pick_tm(M, d_in_pad, d_out_pad, widest_pad, resident_bytes, budget,
             tm_target):
    """Balanced row tile: amortizes ~0.35 us per-grid-step overhead, keeps row
    padding below one tile, gives >=2 tiles when M permits (both v7x cores),
    and shrinks if the working set would not fit next to resident weights."""
    M = max(int(M), 1)
    if M <= _SUBLANE:
        return _SUBLANE
    n_tiles = max(_cdiv(M, tm_target), 2)
    tm = _round_up(_cdiv(M, n_tiles), _SUBLANE)
    if tm >= 16:
        tm = _round_up(tm, 16)            # bf16 packs 2 rows per sublane

    def vmem_need(t):
        io = 2 * 4 * t * (d_in_pad + d_out_pad)    # double-buffered in/out tiles
        act = 6 * t * widest_pad                   # f32 + bf16 activation copies
        return resident_bytes + io + act

    while tm > 2 * _SUBLANE and vmem_need(tm) > budget:
        tm = _round_up(tm // 2, _SUBLANE)
    return tm


def _largest_tile(dim, cap):
    """Largest multiple of 128 dividing `dim` (itself a x128 multiple), <= cap."""
    t = max(min(cap, dim) // _LANE * _LANE, _LANE)
    while t > _LANE and dim % t:
        t -= _LANE
    return t


# --------------------------------------------------------------------------- #
# Fused (weights-resident) path
# --------------------------------------------------------------------------- #
def _mlp_fused(x2d, prepped, output_dim, budget, tm_target):
    M, d_in = x2d.shape
    num_layers = len(prepped)
    d_in_pad = prepped[0][0].shape[0]
    d_out_pad = prepped[-1][0].shape[1]
    widest = max([d_in_pad] + [w.shape[1] for w, _ in prepped])
    w_bytes = sum(int(w.size) * w.dtype.itemsize + int(b.size) * 4
                  for w, b in prepped)

    tm = _pick_tm(M, d_in_pad, d_out_pad, widest, 2 * w_bytes, budget, tm_target)
    m_pad = _round_up(M, tm)

    # Skip the extra HBM copy of x when it is already lane/row aligned.
    if d_in == d_in_pad and M == m_pad:
        x_p = x2d
    else:
        x_p = jnp.zeros((m_pad, d_in_pad), jnp.float32).at[:M, :d_in].set(x2d)

    flat_wb, wb_shapes = [], []
    for w_t, b_p in prepped:
        flat_wb.extend((w_t, b_p))
        wb_shapes.extend((w_t.shape, b_p.shape))

    io_act = 2 * 4 * tm * (d_in_pad + d_out_pad) + 6 * tm * widest
    vmem_limit = int(min(max(2 * (w_bytes + io_act), 32 * _MIB), budget))
    cost = pl.CostEstimate(
        flops=2 * m_pad * sum(w.shape[0] * w.shape[1] for w, _ in prepped),
        transcendentals=0,
        bytes_accessed=int(4 * x_p.size + 4 * m_pad * d_out_pad + w_bytes))

    kernel = functools.partial(_mlp_fused_kernel, num_layers=num_layers)

    def call(single_buffer_weights):
        in_specs = [pl.BlockSpec((tm, d_in_pad), lambda i: (i, 0))]
        for shp in wb_shapes:
            if single_buffer_weights:
                # Grid-invariant operand: nothing to prefetch -> 1 buffer.
                spec = pl.BlockSpec(shp, lambda i: (0, 0),
                                    pipeline_mode=pl.Buffered(1))
            else:
                spec = pl.BlockSpec(shp, lambda i: (0, 0))
            in_specs.append(spec)
        return pl.pallas_call(
            kernel,
            out_shape=jax.ShapeDtypeStruct((m_pad, d_out_pad), jnp.float32),
            grid_spec=pltpu.PrefetchScalarGridSpec(
                num_scalar_prefetch=0,
                grid=(m_pad // tm,),
                in_specs=in_specs,
                out_specs=pl.BlockSpec((tm, d_out_pad), lambda i: (i, 0)),
            ),
            compiler_params=pltpu.CompilerParams(
                dimension_semantics=("parallel",),
                vmem_limit_bytes=vmem_limit,
            ),
            cost_estimate=cost,
        )(x_p, *flat_wb)

    out_p = None
    for single in (True, False):     # prefer single-buffered resident weights
        try:
            out_p = call(single)
            break
        except Exception:
            out_p = None
    if out_p is None:                # fused plan did not fit/compile -> tile it
        return _mlp_tiled(x2d, prepped, output_dim, budget)
    return out_p[:M, :output_dim]


# --------------------------------------------------------------------------- #
# K/N-tiled per-layer fallback (resident weights would not fit in VMEM)
# --------------------------------------------------------------------------- #
def _mlp_tiled(x2d, prepped, output_dim, budget):
    """Intermediates round-trip HBM, but every layer is still a single fused
    matmul+bias(+ReLU) pallas_call with a pipelined (M, N, K) grid."""
    M, d_in = x2d.shape
    num_layers = len(prepped)
    d_in_pad = prepped[0][0].shape[0]
    tm = _round_up(min(256, _round_up(M, _SUBLANE)), _SUBLANE)
    m_pad = _round_up(M, tm)
    if d_in == d_in_pad and M == m_pad:
        h = x2d
    else:
        h = jnp.zeros((m_pad, d_in_pad), jnp.float32).at[:M, :d_in].set(x2d)
    for li, (w_t, b_p) in enumerate(prepped):
        h = _linear_tiled(h, w_t, b_p, apply_relu=(li < num_layers - 1),
                          tm=tm, budget=budget)
    return h[:M, :output_dim]


def _linear_tiled(x_p, w, b, *, apply_relu, tm, budget):
    m_pad, k_pad = x_p.shape
    n_pad = w.shape[1]
    tk = _largest_tile(k_pad, 512)
    tn = _largest_tile(n_pad, 256)
    need = 2 * (4 * tm * tk + 2 * tk * tn + 4 * tn + 4 * tm * tn) + 4 * tm * tn
    vmem_limit = int(min(max(2 * need, 32 * _MIB), budget))
    kernel = functools.partial(_linear_tiled_kernel, apply_relu=apply_relu)
    return pl.pallas_call(
        kernel,
        out_shape=jax.ShapeDtypeStruct((m_pad, n_pad), jnp.float32),
        grid_spec=pltpu.PrefetchScalarGridSpec(
            num_scalar_prefetch=0,
            grid=(m_pad // tm, n_pad // tn, k_pad // tk),
            in_specs=[pl.BlockSpec((tm, tk), lambda i, j, k: (i, k)),
                      pl.BlockSpec((tk, tn), lambda i, j, k: (k, j)),
                      pl.BlockSpec((1, tn), lambda i, j, k: (0, j))],
            out_specs=pl.BlockSpec((tm, tn), lambda i, j, k: (i, j)),
            scratch_shapes=[pltpu.VMEM((tm, tn), jnp.float32)],
        ),
        compiler_params=pltpu.CompilerParams(
            dimension_semantics=("parallel", "parallel", "arbitrary"),
            vmem_limit_bytes=vmem_limit,
        ),
    )(x_p, w, b)


# --------------------------------------------------------------------------- #
# Public forward
# --------------------------------------------------------------------------- #
def mlp_forward(x, prepped_params, output_dim, *, tm_target=None,
                force_tiled=False):
    """Forward pass identical to the PyTorch MLP (ReLU after every layer but
    the last). x: (..., input_dim) float; matmuls run in bf16 with f32 accum."""
    lead_shape = x.shape[:-1]
    d_in = x.shape[-1]
    x2d = x.reshape(-1, d_in).astype(jnp.float32)

    budget = _vmem_budget_bytes()
    if tm_target is None:
        # Bigger row tiles on 128-MiB-VMEM parts (v5e/v6e); 512 on v7x.
        tm_target = 1024 if budget > 80 * _MIB else 512

    w_bytes = sum(int(w.size) * w.dtype.itemsize + int(b.size) * 4
                  for w, b in prepped_params)
    if force_tiled or w_bytes > int(0.7 * budget):
        out2d = _mlp_tiled(x2d, prepped_params, output_dim, budget)
    else:
        out2d = _mlp_fused(x2d, prepped_params, output_dim, budget, tm_target)
    return out2d.reshape(*lead_shape, output_dim)


if __name__ == "__main__":
    batch, seq = 2, 8
    input_dim, hidden_dim, output_dim, num_layers = 32, 32, 16, 3

    key = jax.random.PRNGKey(0)
    kx, kp = jax.random.split(key)
    x = jax.random.normal(kx, (batch, seq, input_dim), jnp.float32)
    params = init_mlp_params(kp, input_dim, hidden_dim, output_dim, num_layers)

    # One-time weight prep (transpose + lane-dense padding + bf16).
    prepped = prepare_mlp_params(params)

    out = jax.block_until_ready(mlp_forward(x, prepped, output_dim))
    out_tiled = jax.block_until_ready(
        mlp_forward(x, prepped, output_dim, force_tiled=True))

    # Pure-JAX f32 reference (matches the PyTorch module semantics). The
    # kernel uses bf16 matmuls with f32 accumulation, so compare at ~1e-2.
    ref = x.reshape(-1, input_dim)
    for i, (w, b) in enumerate(params):
        ref = ref @ w.T + b
        if i < num_layers - 1:
            ref = jnp.maximum(ref, 0.0)
    ref = ref.reshape(batch, seq, output_dim)

    assert out.shape == (batch, seq, output_dim)
    assert out_tiled.shape == (batch, seq, output_dim)
    assert jnp.allclose(out, ref, rtol=5e-2, atol=5e-2), "fused mismatch vs ref"
    assert jnp.allclose(out_tiled, ref, rtol=5e-2, atol=5e-2), "tiled mismatch vs ref"

    print("KERNEL_OK")
</pallas_src>

<mosaic_0001>
module attributes {stable_mosaic.version = 11 : i64} {
  func.func @_mlp_fused_kernel(%arg0: i32, %arg1: memref<8x128xf32, #tpu.memory_space<vmem>>, %arg2: memref<128x128xbf16, #tpu.memory_space<vmem>>, %arg3: memref<1x128xf32, #tpu.memory_space<vmem>>, %arg4: memref<128x128xbf16, #tpu.memory_space<vmem>>, %arg5: memref<1x128xf32, #tpu.memory_space<vmem>>, %arg6: memref<128x128xbf16, #tpu.memory_space<vmem>>, %arg7: memref<1x128xf32, #tpu.memory_space<vmem>>, %arg8: memref<8x128xf32, #tpu.memory_space<vmem>>) attributes {dimension_semantics = [#tpu.dimension_semantics<parallel>], iteration_bounds = array<i64: 2>, scalar_prefetch = 0 : i64, scratch_operands = 0 : i64, tpu.core_type = #tpu.core_type<tc>, window_params = [{transform_indices = @transform_0, window_bounds = array<i64: 8, 128>}, {pipeline_mode = #tpu.pipeline_mode<synchronous>, transform_indices = @transform_1, window_bounds = array<i64: 128, 128>}, {pipeline_mode = #tpu.pipeline_mode<synchronous>, transform_indices = @transform_2, window_bounds = array<i64: 1, 128>}, {pipeline_mode = #tpu.pipeline_mode<synchronous>, transform_indices = @transform_3, window_bounds = array<i64: 128, 128>}, {pipeline_mode = #tpu.pipeline_mode<synchronous>, transform_indices = @transform_4, window_bounds = array<i64: 1, 128>}, {pipeline_mode = #tpu.pipeline_mode<synchronous>, transform_indices = @transform_5, window_bounds = array<i64: 128, 128>}, {pipeline_mode = #tpu.pipeline_mode<synchronous>, transform_indices = @transform_6, window_bounds = array<i64: 1, 128>}, {transform_indices = @transform_7, window_bounds = array<i64: 8, 128>}]} {
    %c0 = arith.constant 0 : index
    %c0_0 = arith.constant 0 : index
    %0 = vector.load %arg1[%c0, %c0_0] : memref<8x128xf32, #tpu.memory_space<vmem>>, vector<8x128xf32>
    %c0_1 = arith.constant 0 : index
    %c0_2 = arith.constant 0 : index
    %1 = vector.load %arg2[%c0_1, %c0_2] : memref<128x128xbf16, #tpu.memory_space<vmem>>, vector<128x128xbf16>
    %c0_3 = arith.constant 0 : index
    %c0_4 = arith.constant 0 : index
    %2 = vector.load %arg3[%c0_3, %c0_4] : memref<1x128xf32, #tpu.memory_space<vmem>>, vector<1x128xf32>
    %3 = arith.truncf %0 : vector<8x128xf32> to vector<8x128xbf16>
    %cst = arith.constant dense<0.000000e+00> : vector<8x128xf32>
    %4 = tpu.matmul %3, %1, %cst {dimension_numbers = #tpu.dot_dimension_numbers<[1], [0], [0], [1], [0, 0, 1, 1], [], []>} : vector<8x128xbf16>, vector<128x128xbf16>, vector<8x128xf32> -> vector<8x128xf32>
    %5 = vector.broadcast %2 : vector<1x128xf32> to vector<8x128xf32>
    %6 = arith.addf %4, %5 : vector<8x128xf32>
    %cst_5 = arith.constant 0.000000e+00 : f32
    %7 = vector.broadcast %cst_5 : f32 to vector<8x128xf32>
    %8 = arith.maximumf %6, %7 : vector<8x128xf32>
    %c0_6 = arith.constant 0 : index
    %c0_7 = arith.constant 0 : index
    %9 = vector.load %arg4[%c0_6, %c0_7] : memref<128x128xbf16, #tpu.memory_space<vmem>>, vector<128x128xbf16>
    %c0_8 = arith.constant 0 : index
    %c0_9 = arith.constant 0 : index
    %10 = vector.load %arg5[%c0_8, %c0_9] : memref<1x128xf32, #tpu.memory_space<vmem>>, vector<1x128xf32>
    %11 = arith.truncf %8 : vector<8x128xf32> to vector<8x128xbf16>
    %cst_10 = arith.constant dense<0.000000e+00> : vector<8x128xf32>
    %12 = tpu.matmul %11, %9, %cst_10 {dimension_numbers = #tpu.dot_dimension_numbers<[1], [0], [0], [1], [0, 0, 1, 1], [], []>} : vector<8x128xbf16>, vector<128x128xbf16>, vector<8x128xf32> -> vector<8x128xf32>
    %13 = vector.broadcast %10 : vector<1x128xf32> to vector<8x128xf32>
    %14 = arith.addf %12, %13 : vector<8x128xf32>
    %cst_11 = arith.constant 0.000000e+00 : f32
    %15 = vector.broadcast %cst_11 : f32 to vector<8x128xf32>
    %16 = arith.maximumf %14, %15 : vector<8x128xf32>
    %c0_12 = arith.constant 0 : index
    %c0_13 = arith.constant 0 : index
    %17 = vector.load %arg6[%c0_12, %c0_13] : memref<128x128xbf16, #tpu.memory_space<vmem>>, vector<128x128xbf16>
    %c0_14 = arith.constant 0 : index
    %c0_15 = arith.constant 0 : index
    %18 = vector.load %arg7[%c0_14, %c0_15] : memref<1x128xf32, #tpu.memory_space<vmem>>, vector<1x128xf32>
    %19 = arith.truncf %16 : vector<8x128xf32> to vector<8x128xbf16>
    %cst_16 = arith.constant dense<0.000000e+00> : vector<8x128xf32>
    %20 = tpu.matmul %19, %17, %cst_16 {dimension_numbers = #tpu.dot_dimension_numbers<[1], [0], [0], [1], [0, 0, 1, 1], [], []>} : vector<8x128xbf16>, vector<128x128xbf16>, vector<8x128xf32> -> vector<8x128xf32>
    %21 = vector.broadcast %18 : vector<1x128xf32> to vector<8x128xf32>
    %22 = arith.addf %20, %21 : vector<8x128xf32>
    %c0_17 = arith.constant 0 : index
    %c0_18 = arith.constant 0 : index
    %23 = vector.load %arg8[%c0_17, %c0_18] : memref<8x128xf32, #tpu.memory_space<vmem>>, vector<8x128xf32>
    tpu.vector_store %arg8[%c0_17, %c0_18], %22 {strides = array<i32>} : memref<8x128xf32, #tpu.memory_space<vmem>>, vector<8x128xf32>,
    return
  }
  func.func @transform_0(%arg0: i32) -> (i32, i32) {
    %c0_i32 = arith.constant 0 : i32
    %c0_i32_0 = arith.constant 0 : i32
    return %arg0, %c0_i32 : i32, i32
  }
  func.func @transform_1(%arg0: i32) -> (i32, i32) {
    %c0_i32 = arith.constant 0 : i32
    %c0_i32_0 = arith.constant 0 : i32
    %c0_i32_1 = arith.constant 0 : i32
    return %c0_i32, %c0_i32_0 : i32, i32
  }
  func.func @transform_2(%arg0: i32) -> (i32, i32) {
    %c0_i32 = arith.constant 0 : i32
    %c0_i32_0 = arith.constant 0 : i32
    %c0_i32_1 = arith.constant 0 : i32
    return %c0_i32, %c0_i32_0 : i32, i32
  }
  func.func @transform_3(%arg0: i32) -> (i32, i32) {
    %c0_i32 = arith.constant 0 : i32
    %c0_i32_0 = arith.constant 0 : i32
    %c0_i32_1 = arith.constant 0 : i32
    return %c0_i32, %c0_i32_0 : i32, i32
  }
  func.func @transform_4(%arg0: i32) -> (i32, i32) {
    %c0_i32 = arith.constant 0 : i32
    %c0_i32_0 = arith.constant 0 : i32
    %c0_i32_1 = arith.constant 0 : i32
    return %c0_i32, %c0_i32_0 : i32, i32
  }
  func.func @transform_5(%arg0: i32) -> (i32, i32) {
    %c0_i32 = arith.constant 0 : i32
    %c0_i32_0 = arith.constant 0 : i32
    %c0_i32_1 = arith.constant 0 : i32
    return %c0_i32, %c0_i32_0 : i32, i32
  }
  func.func @transform_6(%arg0: i32) -> (i32, i32) {
    %c0_i32 = arith.constant 0 : i32
    %c0_i32_0 = arith.constant 0 : i32
    %c0_i32_1 = arith.constant 0 : i32
    return %c0_i32, %c0_i32_0 : i32, i32
  }
  func.func @transform_7(%arg0: i32) -> (i32, i32) {
    %c0_i32 = arith.constant 0 : i32
    %c0_i32_0 = arith.constant 0 : i32
    return %arg0, %c0_i32 : i32, i32
  }
}

module attributes {stable_mosaic.version = 11 : i64} {
  func.func @_mlp_fused_kernel(%arg0: i32, %arg1: memref<8x128xf32, #tpu.memory_space<vmem>>, %arg2: memref<128x128xbf16, #tpu.memory_space<vmem>>, %arg3: memref<1x128xf32, #tpu.memory_space<vmem>>, %arg4: memref<128x128xbf16, #tpu.memory_space<vmem>>, %arg5: memref<1x128xf32, #tpu.memory_space<vmem>>, %arg6: memref<128x128xbf16, #tpu.memory_space<vmem>>, %arg7: memref<1x128xf32, #tpu.memory_space<vmem>>, %arg8: memref<8x128xf32, #tpu.memory_space<vmem>>) attributes {dimension_semantics = [#tpu.dimension_semantics<parallel>], iteration_bounds = array<i64: 2>, scalar_prefetch = 0 : i64, scratch_operands = 0 : i64, tpu.core_type = #tpu.core_type<tc>, window_params = [{transform_indices = @transform_0, window_bounds = array<i64: 8, 128>}, {pipeline_mode = #tpu.pipeline_mode<synchronous>, transform_indices = @transform_1, window_bounds = array<i64: 128, 128>}, {pipeline_mode = #tpu.pipeline_mode<synchronous>, transform_indices = @transform_2, window_bounds = array<i64: 1, 128>}, {pipeline_mode = #tpu.pipeline_mode<synchronous>, transform_indices = @transform_3, window_bounds = array<i64: 128, 128>}, {pipeline_mode = #tpu.pipeline_mode<synchronous>, transform_indices = @transform_4, window_bounds = array<i64: 1, 128>}, {pipeline_mode = #tpu.pipeline_mode<synchronous>, transform_indices = @transform_5, window_bounds = array<i64: 128, 128>}, {pipeline_mode = #tpu.pipeline_mode<synchronous>, transform_indices = @transform_6, window_bounds = array<i64: 1, 128>}, {transform_indices = @transform_7, window_bounds = array<i64: 8, 128>}]} {
    %c0 = arith.constant 0 : index
    %c0_0 = arith.constant 0 : index
    %0 = vector.load %arg1[%c0, %c0_0] : memref<8x128xf32, #tpu.memory_space<vmem>>, vector<8x128xf32>
    %c0_1 = arith.constant 0 : index
    %c0_2 = arith.constant 0 : index
    %1 = vector.load %arg2[%c0_1, %c0_2] : memref<128x128xbf16, #tpu.memory_space<vmem>>, vector<128x128xbf16>
    %c0_3 = arith.constant 0 : index
    %c0_4 = arith.constant 0 : index
    %2 = vector.load %arg3[%c0_3, %c0_4] : memref<1x128xf32, #tpu.memory_space<vmem>>, vector<1x128xf32>
    %3 = arith.truncf %0 : vector<8x128xf32> to vector<8x128xbf16>
    %cst = arith.constant dense<0.000000e+00> : vector<8x128xf32>
    %4 = tpu.matmul %3, %1, %cst {dimension_numbers = #tpu.dot_dimension_numbers<[1], [0], [0], [1], [0, 0, 1, 1], [], []>} : vector<8x128xbf16>, vector<128x128xbf16>, vector<8x128xf32> -> vector<8x128xf32>
    %5 = vector.broadcast %2 : vector<1x128xf32> to vector<8x128xf32>
    %6 = arith.addf %4, %5 : vector<8x128xf32>
    %cst_5 = arith.constant 0.000000e+00 : f32
    %7 = vector.broadcast %cst_5 : f32 to vector<8x128xf32>
    %8 = arith.maximumf %6, %7 : vector<8x128xf32>
    %c0_6 = arith.constant 0 : index
    %c0_7 = arith.constant 0 : index
    %9 = vector.load %arg4[%c0_6, %c0_7] : memref<128x128xbf16, #tpu.memory_space<vmem>>, vector<128x128xbf16>
    %c0_8 = arith.constant 0 : index
    %c0_9 = arith.constant 0 : index
    %10 = vector.load %arg5[%c0_8, %c0_9] : memref<1x128xf32, #tpu.memory_space<vmem>>, vector<1x128xf32>
    %11 = arith.truncf %8 : vector<8x128xf32> to vector<8x128xbf16>
    %cst_10 = arith.constant dense<0.000000e+00> : vector<8x128xf32>
    %12 = tpu.matmul %11, %9, %cst_10 {dimension_numbers = #tpu.dot_dimension_numbers<[1], [0], [0], [1], [0, 0, 1, 1], [], []>} : vector<8x128xbf16>, vector<128x128xbf16>, vector<8x128xf32> -> vector<8x128xf32>
    %13 = vector.broadcast %10 : vector<1x128xf32> to vector<8x128xf32>
    %14 = arith.addf %12, %13 : vector<8x128xf32>
    %cst_11 = arith.constant 0.000000e+00 : f32
    %15 = vector.broadcast %cst_11 : f32 to vector<8x128xf32>
    %16 = arith.maximumf %14, %15 : vector<8x128xf32>
    %c0_12 = arith.constant 0 : index
    %c0_13 = arith.constant 0 : index
    %17 = vector.load %arg6[%c0_12, %c0_13] : memref<128x128xbf16, #tpu.memory_space<vmem>>, vector<128x128xbf16>
    %c0_14 = arith.constant 0 : index
    %c0_15 = arith.constant 0 : index
    %18 = vector.load %arg7[%c0_14, %c0_15] : memref<1x128xf32, #tpu.memory_space<vmem>>, vector<1x128xf32>
    %19 = arith.truncf %16 : vector<8x128xf32> to vector<8x128xbf16>
    %cst_16 = arith.constant dense<0.000000e+00> : vector<8x128xf32>
    %20 = tpu.matmul %19, %17, %cst_16 {dimension_numbers = #tpu.dot_dimension_numbers<[1], [0], [0], [1], [0, 0, 1, 1], [], []>} : vector<8x128xbf16>, vector<128x128xbf16>, vector<8x128xf32> -> vector<8x128xf32>
    %21 = vector.broadcast %18 : vector<1x128xf32> to vector<8x128xf32>
    %22 = arith.addf %20, %21 : vector<8x128xf32>
    %c0_17 = arith.constant 0 : index
    %c0_18 = arith.constant 0 : index
    %23 = vector.load %arg8[%c0_17, %c0_18] : memref<8x128xf32, #tpu.memory_space<vmem>>, vector<8x128xf32>
    tpu.vector_store %arg8[%c0_17, %c0_18], %22 {strides = array<i32>} : memref<8x128xf32, #tpu.memory_space<vmem>>, vector<8x128xf32>,
    return
  }
  func.func @transform_0(%arg0: i32) -> (i32, i32) {
    %c0_i32 = arith.constant 0 : i32
    %c0_i32_0 = arith.constant 0 : i32
    return %arg0, %c0_i32 : i32, i32
  }
  func.func @transform_1(%arg0: i32) -> (i32, i32) {
    %c0_i32 = arith.constant 0 : i32
    %c0_i32_0 = arith.constant 0 : i32
    %c0_i32_1 = arith.constant 0 : i32
    return %c0_i32, %c0_i32_0 : i32, i32
  }
  func.func @transform_2(%arg0: i32) -> (i32, i32) {
    %c0_i32 = arith.constant 0 : i32
    %c0_i32_0 = arith.constant 0 : i32
    %c0_i32_1 = arith.constant 0 : i32
    return %c0_i32, %c0_i32_0 : i32, i32
  }
  func.func @transform_3(%arg0: i32) -> (i32, i32) {
    %c0_i32 = arith.constant 0 : i32
    %c0_i32_0 = arith.constant 0 : i32
    %c0_i32_1 = arith.constant 0 : i32
    return %c0_i32, %c0_i32_0 : i32, i32
  }
  func.func @transform_4(%arg0: i32) -> (i32, i32) {
    %c0_i32 = arith.constant 0 : i32
    %c0_i32_0 = arith.constant 0 : i32
    %c0_i32_1 = arith.constant 0 : i32
    return %c0_i32, %c0_i32_0 : i32, i32
  }
  func.func @transform_5(%arg0: i32) -> (i32, i32) {
    %c0_i32 = arith.constant 0 : i32
    %c0_i32_0 = arith.constant 0 : i32
    %c0_i32_1 = arith.constant 0 : i32
    return %c0_i32, %c0_i32_0 : i32, i32
  }
  func.func @transform_6(%arg0: i32) -> (i32, i32) {
    %c0_i32 = arith.constant 0 : i32
    %c0_i32_0 = arith.constant 0 : i32
    %c0_i32_1 = arith.constant 0 : i32
    return %c0_i32, %c0_i32_0 : i32, i32
  }
  func.func @transform_7(%arg0: i32) -> (i32, i32) {
    %c0_i32 = arith.constant 0 : i32
    %c0_i32_0 = arith.constant 0 : i32
    return %arg0, %c0_i32 : i32, i32
  }
}

module attributes {stable_mosaic.version = 11 : i64} {
  func.func @_linear_tiled_kernel(%arg0: i32, %arg1: i32, %arg2: i32, %arg3: memref<16x128xf32, #tpu.memory_space<vmem>>, %arg4: memref<128x128xbf16, #tpu.memory_space<vmem>>, %arg5: memref<1x128xf32, #tpu.memory_space<vmem>>, %arg6: memref<16x128xf32, #tpu.memory_space<vmem>>, %arg7: memref<16x128xf32, #tpu.memory_space<vmem>>) attributes {dimension_semantics = [#tpu.dimension_semantics<parallel>, #tpu.dimension_semantics<parallel>, #tpu.dimension_semantics<arbitrary>], iteration_bounds = array<i64: 1, 1, 1>, scalar_prefetch = 0 : i64, scratch_operands = 1 : i64, tpu.core_type = #tpu.core_type<tc>, window_params = [{transform_indices = @transform_0, window_bounds = array<i64: 16, 128>}, {transform_indices = @transform_1, window_bounds = array<i64: 128, 128>}, {transform_indices = @transform_2, window_bounds = array<i64: 1, 128>}, {transform_indices = @transform_3, window_bounds = array<i64: 16, 128>}]} {
    %c0_i32 = arith.constant 0 : i32
    %0 = arith.cmpi eq, %arg2, %c0_i32 : i32
    %1 = arith.extui %0 : i1 to i32
    %c0_i32_0 = arith.constant 0 : i32
    %2 = arith.cmpi ne, %1, %c0_i32_0 : i32
    scf.if %2 {
      %cst_10 = arith.constant 0.000000e+00 : f32
      %13 = vector.broadcast %cst_10 : f32 to vector<16x128xf32>
      %c0_11 = arith.constant 0 : index
      %c0_12 = arith.constant 0 : index
      %14 = vector.load %arg7[%c0_11, %c0_12] : memref<16x128xf32, #tpu.memory_space<vmem>>, vector<16x128xf32>
      tpu.vector_store %arg7[%c0_11, %c0_12], %13 {strides = array<i32>} : memref<16x128xf32, #tpu.memory_space<vmem>>, vector<16x128xf32>,
    } else {
    }
    %c0 = arith.constant 0 : index
    %c0_1 = arith.constant 0 : index
    %3 = vector.load %arg7[%c0, %c0_1] : memref<16x128xf32, #tpu.memory_space<vmem>>, vector<16x128xf32>
    %c0_2 = arith.constant 0 : index
    %c0_3 = arith.constant 0 : index
    %4 = vector.load %arg3[%c0_2, %c0_3] : memref<16x128xf32, #tpu.memory_space<vmem>>, vector<16x128xf32>
    %5 = arith.truncf %4 : vector<16x128xf32> to vector<16x128xbf16>
    %c0_4 = arith.constant 0 : index
    %c0_5 = arith.constant 0 : index
    %6 = vector.load %arg4[%c0_4, %c0_5] : memref<128x128xbf16, #tpu.memory_space<vmem>>, vector<128x128xbf16>
    %cst = arith.constant dense<0.000000e+00> : vector<16x128xf32>
    %7 = tpu.matmul %5, %6, %cst {dimension_numbers = #tpu.dot_dimension_numbers<[1], [0], [0], [1], [0, 0, 1, 1], [], []>} : vector<16x128xbf16>, vector<128x128xbf16>, vector<16x128xf32> -> vector<16x128xf32>
    %8 = arith.addf %3, %7 : vector<16x128xf32>
    %c0_6 = arith.constant 0 : index
    %c0_7 = arith.constant 0 : index
    %9 = vector.load %arg7[%c0_6, %c0_7] : memref<16x128xf32, #tpu.memory_space<vmem>>, vector<16x128xf32>
    tpu.vector_store %arg7[%c0_6, %c0_7], %8 {strides = array<i32>} : memref<16x128xf32, #tpu.memory_space<vmem>>, vector<16x128xf32>,
    %c0_i32_8 = arith.constant 0 : i32
    %10 = arith.cmpi eq, %arg2, %c0_i32_8 : i32
    %11 = arith.extui %10 : i1 to i32
    %c0_i32_9 = arith.constant 0 : i32
    %12 = arith.cmpi ne, %11, %c0_i32_9 : i32
    scf.if %12 {
      %c0_10 = arith.constant 0 : index
      %c0_11 = arith.constant 0 : index
      %13 = vector.load %arg7[%c0_10, %c0_11] : memref<16x128xf32, #tpu.memory_space<vmem>>, vector<16x128xf32>
      %c0_12 = arith.constant 0 : index
      %c0_13 = arith.constant 0 : index
      %14 = vector.load %arg5[%c0_12, %c0_13] : memref<1x128xf32, #tpu.memory_space<vmem>>, vector<1x128xf32>
      %15 = vector.broadcast %14 : vector<1x128xf32> to vector<16x128xf32>
      %16 = arith.addf %13, %15 : vector<16x128xf32>
      %cst_14 = arith.constant 0.000000e+00 : f32
      %17 = vector.broadcast %cst_14 : f32 to vector<16x128xf32>
      %18 = arith.maximumf %16, %17 : vector<16x128xf32>
      %c0_15 = arith.constant 0 : index
      %c0_16 = arith.constant 0 : index
      %19 = vector.load %arg6[%c0_15, %c0_16] : memref<16x128xf32, #tpu.memory_space<vmem>>, vector<16x128xf32>
      tpu.vector_store %arg6[%c0_15, %c0_16], %18 {strides = array<i32>} : memref<16x128xf32, #tpu.memory_space<vmem>>, vector<16x128xf32>,
    } else {
    }
    return
  }
  func.func @transform_0(%arg0: i32, %arg1: i32, %arg2: i32) -> (i32, i32) {
    %c0_i32 = arith.constant 0 : i32
    return %arg0, %arg2 : i32, i32
  }
  func.func @transform_1(%arg0: i32, %arg1: i32, %arg2: i32) -> (i32, i32) {
    %c0_i32 = arith.constant 0 : i32
    return %arg2, %arg1 : i32, i32
  }
  func.func @transform_2(%arg0: i32, %arg1: i32, %arg2: i32) -> (i32, i32) {
    %c0_i32 = arith.constant 0 : i32
    %c0_i32_0 = arith.constant 0 : i32
    return %c0_i32, %arg1 : i32, i32
  }
  func.func @transform_3(%arg0: i32, %arg1: i32, %arg2: i32) -> (i32, i32) {
    %c0_i32 = arith.constant 0 : i32
    return %arg0, %arg1 : i32, i32
  }
}

</mosaic_0001>

<bundles_post_ra>
// kernel: tpu_custom_call.1
= control target key start
LH: loop header
LB: loop body
LE: loop exit
PB: predicated region body
PF: predicated region fallthrough
CT: control target
= control target key end

     0   :  { %s1493_s0 = inlined_call_operand.hbm [shape: f32[16,128], index: 0, kind: input, shape index: {}]   ;;  %s1494_s1 = inlined_call_operand.hbm [shape: bf16[128,128], index: 1, kind: input, shape index: {}]   ;;  %s1495_s2 = inlined_call_operand.vmem [shape: f32[1,128], index: 2, kind: input, shape index: {}]   ;;  %s1496_s3 = inlined_call_operand.hbm [shape: bf16[128,128], index: 3, kind: input, shape index: {}]   ;;  %s1497_s4 = inlined_call_operand.vmem [shape: f32[1,128], index: 4, kind: input, shape index: {}]   ;;  %s1498_s5 = inlined_call_operand.hbm [shape: bf16[128,128], index: 5, kind: input, shape index: {}]   ;;  %s1499_s6 = inlined_call_operand.vmem [shape: f32[1,128], index: 6, kind: input, shape index: {}]   ;;  %s1500_s7 = inlined_call_operand.hbm [shape: f32[16,128], index: 7, kind: output, shape index: {}]  }
   0x1   :  { %1505 = sst [smem:[#allocation15_spill]] %s1494_s1 }
   0x2   :  { %1506 = sst [smem:[#allocation16_spill]] %s1496_s3 }
   0x3   :  { %12 = vsyncpa [#allocation3], 0 }
   0x4   :  { %14 = vsyncpa [#allocation3 + $0x1], 0 }
   0x5   :  { %15 = vsyncpa [#allocation6], 0 }
   0x6   :  { %16 = vsyncpa [#allocation9], 0 }
   0x7   :  { %17 = vsyncpa [#allocation4], 0 }
   0x8   :  { %19 = vsyncpa [#allocation4 + $0x1], 0  ;;  %s1258_s24 = smov 0   ;;  %s1260_s25 = smov 0  }
   0x9   :  { %s1262_s26 = smov 0   ;;  %s1264_s27 = smov 0  }
   0xa LB: > { %s1279_s28 = sadd.s32 4294967295, %s1207_s27   ;;  %s792_s29 = sadd.s32 4294967294, %s1207_s27   ;;  %s1207_s27 = sphi %s1264_s27, %s1528_s27   ;;  %s1203_s26 = sphi %s1262_s26, %s1527_s26   ;;  %s1199_s25 = sphi %s1260_s25, %s1526_s25   ;;  %s1195_s24 = sphi %s1258_s24, %s1525_s24  }
   0xb   : > { %p45_p0 = scmp.ne.s32.totalorder %s1199_s25, %s1195_s24  ;;  %p1501_p1 = scmp.eq.s32.totalorder %s1279_s28, 0 }
   0xc   : > { %p201_p3 = scmp.eq.s32.totalorder %s792_s29, 1  ;;  %p793_p5 = scmp.ge.s32.totalorder %s1207_s27, 1 }
   0xd   : > { %p1288_p4 = por %p1501_p1, %p45_p0  ;;  %p208_p7 = scmp.lt.s32.totalorder %s1207_s27, 3 }
   0xe   : > { %p1293_p6 = por %p201_p3, %p45_p0  ;;  %s1209_s10 = smov [#allocation5]  }
   0xf   : > { %s1507_s30 = scalar_select %p1288_p4, 1, 0 }
  0x10   : > { %s1508_s8 = scalar_select %p1293_p6, 1, 0 }
  0x11   : > { %p1298_p8 = pnand %p793_p5, %p208_p7  ;;  %s220_s11 = sshll.u32 %s1209_s10, 4  ;;  %s221_s11 = int_to_ptr.vmem [resolvable:$true] %s220_s11 }
  0x12   : > { %s1210_s13 = smov [#allocation7]   ;;  %s1211_s15 = smov [#allocation8]  }
  0x13   : > { %s1509_s9 = scalar_select %p1298_p8, 1, 0 }
  0x14   : > { %p940_p9 = pneg %p1298_p8  ;;  %s236_s14 = sshll.u32 %s1210_s13, 4  ;;  %s237_s14 = int_to_ptr.vmem [resolvable:$true] %s236_s14 }
  0x15   : > { %s252_s16 = sshll.u32 %s1211_s15, 4  ;;  %s1040_s17 = scalar_lea.vmem %s221_s11, 1024  ;;  %s253_s16 = int_to_ptr.vmem [resolvable:$true] %s252_s16 }
  0x16   : > { %p1307_p11 = pnand %p940_p9, %p1501_p1  ;;  %p1041_p13 = scmp.ne.s32.totalorder %s221_s11, %s1040_s17 }
  0x17   : > { %p1048_p5 = scmp.lt.s32.totalorder %s221_s11, %s221_s11  ;;  %p1049_p7 = scmp.lt.s32.totalorder %s1040_s17, %s1040_s17 }
  0x18   : > { %p1031_p12 = pneg %p1307_p11 }
  0x19   : > { %p1050_p9 = por %p1049_p7, %p1048_p5 }
  0x1a   : > { %p1043_p0 = pnand %p1041_p13, %p1031_p12 }
  0x1c   : > { %p1044_p3 = pneg %p1043_p0 }
  0x1e   : > { %p1051_p10 = pnand %p1050_p9, %p1044_p3 }
  0x20   : > { %1054 = shalt.err (!%p1051_p10)
}
  0x21   : > { %s1212_s18 = smov 64   ;;  %s1213_s19 = smov 4  }
  0x22   : > { %s1511_s1 = sld [smem:[#allocation15_spill]]  ;;  %s1066_s22 = scalar_lea.vmem %s237_s14, 1024 }
  0x23   : > { %p1067_p1 = scmp.ne.s32.totalorder %s237_s14, %s1066_s22  ;;  %p1074_p2 = scmp.lt.s32.totalorder %s237_s14, %s237_s14 }
  0x24   : > { %p1075_p6 = scmp.lt.s32.totalorder %s1066_s22, %s1066_s22 }
  0x25   : > { %p1069_p13 = pnand %p1067_p1, %p1031_p12 }
  0x26   : > { %p1076_p5 = por %p1075_p6, %p1074_p2 }
  0x27   : > { %p1070_p0 = pneg %p1069_p13 }
  0x28   : > { %943 = dma.hbm_to_vmem [thread:$0]  (!%p1307_p11), %s1511_s1, 1024, %s221_s11, [#allocation6], %s1212_s18, %s1212_s18, %s1213_s19  }
  0x29   : > { %p1077_p3 = pnand %p1076_p5, %p1070_p0 }
  0x2b   : > { %1080 = shalt.err (!%p1077_p3)
}
  0x2c   : > { %s1512_s3 = sld [smem:[#allocation16_spill]]  ;;  %s1092_s10 = scalar_lea.vmem %s253_s16, 1024 }
  0x2d   : > { %p1093_p10 = scmp.ne.s32.totalorder %s253_s16, %s1092_s10  ;;  %p1100_p9 = scmp.lt.s32.totalorder %s253_s16, %s253_s16 }
  0x2e   : > { %p1101_p13 = scmp.lt.s32.totalorder %s1092_s10, %s1092_s10 }
  0x2f   : > { %p1095_p7 = pnand %p1093_p10, %p1031_p12 }
  0x30   : > { %p1102_p4 = por %p1101_p13, %p1100_p9 }
  0x31   : > { %p1096_p1 = pneg %p1095_p7 }
  0x32   : > { %946 = dma.hbm_to_vmem [thread:$0]  (!%p1307_p11), %s1512_s3, 1024, %s237_s14, [#allocation6], %s1212_s18, %s1212_s18, %s1213_s19  }
  0x33   : > { %p1103_p2 = pnand %p1102_p4, %p1096_p1 }
  0x35   : > { %1106 = shalt.err (!%p1103_p2)
}
  0x36   : > { %949 = dma.hbm_to_vmem [thread:$0]  (!%p1307_p11), %s1498_s5, 1024, %s253_s16, [#allocation9], %s1212_s18, %s1212_s18, %s1213_s19  }
  0x37   : > { %s1338_s14 = sadd.s32 1, %s1207_s27   ;;  %s32_s12 = sadd.s32 1, %s1203_s26 }
  0x38   : > { %s29_s15 = ssub.s32 %s1207_s27, %s1338_s14  ;;  %p39_p6 = scmp.ne.s32.totalorder %s1203_s26, %s1199_s25 }
  0x39   : > { %p30_p4 = scmp.eq.s32.totalorder %s29_s15, 0  ;;  %p40_p12 = scmp.eq.s32.totalorder %s1207_s27, 0 }
  0x3a   : > { %p961_p0 = scmp.lt.s32.totalorder %s1207_s27, 2  ;;  %p1513_p3 = scmp.eq.s32.totalorder %s1279_s28, 1 }
  0x3b   : > { %s1348_s17 = scalar_select %p30_p4, %s1203_s26, %s32_s12  }
  0x3c   : > { %p41_p5 = por %p40_p12, %p39_p6  ;;  %p1352_p10 = por %p1513_p3, %p39_p6 }
  0x3d   : > { %s269_s21 = sand.u32 1, %s1203_s26   ;;  %s799_s22 = sshll.u32 %s1207_s27, 7 }
  0x3e   : > { %s1514_s20 = scalar_select %p1352_p10, 1, 0 }
  0x3f   : > { %s798_s16 = sshll.u32 %s269_s21, 3  ;;  %s1361_s23 = scalar_lea.hbm %s1493_s0, %s799_s22 }
  0x40   : > { %s273_s29 = scalar_lea.vmem [#allocation2], %s798_s16  ;;  %p1363_p11 = pnand %p961_p0, %p41_p5 }
  0x41   : > { %s280_s10 = sshll.u32 %s273_s29, 4  ;;  %s270_s13 = scalar_lea.sflag [#allocation3], %s269_s21  ;;  %s281_s10 = int_to_ptr.vmem [resolvable:$true] %s280_s10 }
  0x42   : > { %s1107_s15 = scalar_lea.hbm %s1361_s23, 128  ;;  %p1109_p1 = pneg %p1363_p11 }
  0x43   : > { %p1108_p7 = scmp.ne.s32.totalorder %s1361_s23, %s1107_s15  ;;  %s1112_s18 = scalar_lea.hbm %s1493_s0, 256 }
  0x44   : > { %p1113_p2 = scmp.lt.s32.totalorder %s1361_s23, %s1493_s0  ;;  %p1114_p4 = scmp.lt.s32.totalorder %s1112_s18, %s1107_s15 }
  0x45   : > { %p1110_p9 = pnand %p1109_p1, %p1108_p7 }
  0x46   : > { %p1115_p6 = por %p1114_p4, %p1113_p2 }
  0x47   : > { %p1111_p13 = pneg %p1110_p9 }
  0x49   : > { %p1116_p12 = pnand %p1115_p6, %p1111_p13 }
  0x4b   : > { %1119 = shalt.err (!%p1116_p12)
}
  0x4c   : > { %s1120_s29 = scalar_lea.vmem %s281_s10, 128  ;;  %s1214_s21 = smov [#allocation2]  }
  0x4d   : > { %p1121_p0 = scmp.ne.s32.totalorder %s281_s10, %s1120_s29  ;;  %s1125_s1 = sshll.u32 %s1214_s21, 4  ;;  %s1126_s1 = int_to_ptr.vmem [resolvable:$false] %s1125_s1 }
  0x4e   : > { %s1127_s3 = scalar_lea.vmem %s1126_s1, 256  ;;  %p1128_p7 = scmp.lt.s32.totalorder %s281_s10, %s1126_s1 }
  0x4f   : > { %p1123_p5 = pnand %p1121_p0, %p1109_p1  ;;  %p1129_p9 = scmp.lt.s32.totalorder %s1127_s3, %s1120_s29 }
  0x51   : > { %p1124_p3 = pneg %p1123_p5  ;;  %p1130_p10 = por %p1129_p9, %p1128_p7 }
  0x53   : > { %p1131_p8 = pnand %p1130_p10, %p1124_p3 }
  0x55   : > { %1134 = shalt.err (!%p1131_p8)
}
  0x56   : > { %953 = dma.hbm_to_vmem [thread:$0]  (!%p1363_p11), %s1361_s23, 128, %s281_s10, %s270_s13  }
  0x57   : > { %p1516_p13 = scmp.ne.s32.totalorder %s1509_s9, 0 }
  0x58   : > { %s1384_s15 = sand.u32 (!%p1516_p13), 1, %s1199_s25   ;;  %p1517_p8 = scmp.ne.s32.totalorder (!%p1516_p13), %s1507_s30, 0 }
  0x59   : > { %289 = sbr.rel (%p1516_p13) target bundleno = 742 (0x2e6), region = 48  ;;  %s801_s12 = sshll.u32 (!%p1516_p13), %s1384_s15, 3 }
  0x5a   : > { %s292_s1 = scalar_lea.sflag (!%p1516_p13), [#allocation3], %s1384_s15  ;;  %s1390_s3 = scalar_lea.vmem (!%p1516_p13), [#allocation2], %s801_s12 }
  0x5e   : > { %1178 = dma.done.wait (%p1517_p8), %s292_s1, 128  }
  0x5f   : > { %1180 = vsyncadd (%p1517_p8), %s292_s1, 4294967168  ;;  %p1518_p10 = scmp.eq.s32.totalorder %s1279_s28, 0 }
  0x61   : > { %1182 = dma.done.wait (%p1518_p10), [#allocation6], 2048   ;;  %p1519_p11 = pmov %p1518_p10 }
  0x62   : > { %p1520_p1 = pmov %p1518_p10 }
  0x63   : > { %1184 = vsyncadd (%p1519_p11), [#allocation6], 4294965248 }
  0x64   : > { %1186 = dma.done.wait (%p1520_p1), [#allocation9], 1024   ;;  %p1521_p2 = pmov %p1520_p1 }
  0x65   : > { %v1215_v0 = vmov 0.0   ;;  %vm1216_vm0 = vmmov 0   ;;  %v1005_v1 = vld [vmem:[#allocation5 + $0x38] sm:$0xff]   ;;  %v1006_v2 = vld [vmem:[#allocation5 + $0x30] sm:$0xff]   ;;  %v1007_v3 = vld [vmem:[#allocation5 + $0x28] sm:$0xff]   ;;  %s834_s22 = sshll.u32 %s1279_s28, 7 }
  0x66   : > { %1188 = vsyncadd (%p1521_p2), [#allocation9], 4294966272  ;;  %864 = vmatprep.subr.bf16.mxu0 %v1215_v0  ;;  %880 = vmatprep.mubr.msk.bf16.mxu0 %vm1216_vm0, %v1215_v0  ;;  %v1013_v4 = vld [vmem:[#allocation7 + $0x38] sm:$0xff]   ;;  %v1008_v5 = vld [vmem:[#allocation5 + $0x20] sm:$0xff]   ;;  %s337_s18 = scalar_lea.vmem [#allocation10], %s801_s12  ;;  %s1450_s21 = scalar_lea.hbm %s1500_s7, %s834_s22 }
  0x67   : > { %884 = vmatprep.subr.bf16.mxu1 %v1215_v0  ;;  %900 = vmatprep.mubr.msk.bf16.mxu1 %vm1216_vm0, %v1215_v0  ;;  %v1014_v6 = vld [vmem:[#allocation7 + $0x30] sm:$0xff]   ;;  %v1009_v7 = vld [vmem:[#allocation5 + $0x18] sm:$0xff]   ;;  %v1015_v8 = vld [vmem:[#allocation7 + $0x28] sm:$0xff]   ;;  %s693_s19 = sshll.u32 %s337_s18, 4  ;;  %s680_s1 = scalar_lea.sflag [#allocation4], %s1384_s15  ;;  %s1452_s19 = int_to_ptr.vmem [resolvable:$true] %s693_s19 }
  0x68   : > { %865 = vmatpush3.bf16.msra.mxu0 %v1005_v1  ;;  %885 = vmatpush3.bf16.msra.mxu1 %v1013_v4  ;;  %v1010_v9 = vld [vmem:[#allocation5 + $0x10] sm:$0xff]   ;;  %v1016_v10 = vld [vmem:[#allocation7 + $0x20] sm:$0xff]   ;;  %v1011_v11 = vld [vmem:[#allocation5 + $0x8] sm:$0xff]   ;;  %s1135_s28 = scalar_lea.vmem %s1452_s19, 128  ;;  %p1522_p6 = scmp.ne.s32.totalorder %s1514_s20, 0 }
  0x69   : > { %866 = vmatprep.subr.bf16.mxu0 %v1215_v0  ;;  %886 = vmatprep.subr.bf16.mxu1 %v1215_v0  ;;  %v1017_v12 = vld [vmem:[#allocation7 + $0x18] sm:$0xff]   ;;  %v1012_v13 = vld [vmem:[#allocation5] sm:$0xff]   ;;  %v1018_v15 = vld [vmem:[#allocation7 + $0x10] sm:$0xff]   ;;  %p1136_p4 = scmp.ne.s32.totalorder %s1452_s19, %s1135_s28  ;;  %s1217_s12 = smov [#allocation10]  }
  0x6a   : > { %v339_v14 = vld [vmem:[%s1390_s3] sm:$0xff]  ;;  %v1019_v17 = vld [vmem:[#allocation7 + $0x8] sm:$0xff]   ;;  %v1020_v18 = vld [vmem:[#allocation7] sm:$0xff]   ;;  %s1139_s3 = sshll.u32 %s1217_s12, 4  ;;  %s1140_s3 = int_to_ptr.vmem [resolvable:$false] %s1139_s3 }
  0x6b   : > { %v357_v16 = vpack.c.bf16 %v339_v14, %v339_v14  ;;  %v1021_v19 = vld [vmem:[#allocation8 + $0x38] sm:$0xff]   ;;  %v1022_v20 = vld [vmem:[#allocation8 + $0x30] sm:$0xff]   ;;  %v1023_v21 = vld [vmem:[#allocation8 + $0x28] sm:$0xff]   ;;  %p1137_p12 = pnand %p1136_p4, %p1522_p6  ;;  %s1141_s30 = scalar_lea.vmem %s1140_s3, 256 }
  0x6c   : > { %867 = vmatpush3.bf16.msra.mxu0 %v1006_v2  ;;  %887 = vmatpush3.bf16.msra.mxu1 %v1014_v6  ;;  %v1024_v22 = vld [vmem:[#allocation8 + $0x20] sm:$0xff]   ;;  %v1025_v23 = vld [vmem:[#allocation8 + $0x18] sm:$0xff]   ;;  %v1026_v24 = vld [vmem:[#allocation8 + $0x10] sm:$0xff]   ;;  %p1142_p5 = scmp.lt.s32.totalorder %s1452_s19, %s1140_s3  ;;  %p1143_p3 = scmp.lt.s32.totalorder %s1141_s30, %s1135_s28 }
  0x6d   : > { %868 = vmatprep.subr.bf16.mxu0 %v1215_v0  ;;  %888 = vmatprep.subr.bf16.mxu1 %v1215_v0  ;;  %v806_v25 = vld [vmem:[%s1495_s2] ss:$0 sm:$0xff]  ;;  %v1027_v33 = vld [vmem:[#allocation8 + $0x8] sm:$0xff]   ;;  %v1028_v34 = vld [vmem:[#allocation8] sm:$0xff]   ;;  %p1138_p0 = pneg %p1137_p12 }
  0x6e   : > { %v815_v35 = vld [vmem:[%s1497_s4] ss:$0 sm:$0xff]  ;;  %p1144_p7 = por %p1143_p3, %p1142_p5 }
  0x6f   : > { %v824_v43 = vld [vmem:[%s1499_s6] ss:$0 sm:$0xff] }
  0x70   : > { %869 = vmatpush3.bf16.msra.mxu0 %v1007_v3  ;;  %889 = vmatpush3.bf16.msra.mxu1 %v1015_v8  ;;  %p1145_p9 = pnand %p1144_p7, %p1138_p0 }
  0x71   : > { %870 = vmatprep.subr.bf16.mxu0 %v1215_v0  ;;  %890 = vmatprep.subr.bf16.mxu1 %v1215_v0 }
  0x74   : > { %871 = vmatpush3.bf16.msra.mxu0 %v1008_v5  ;;  %891 = vmatpush3.bf16.msra.mxu1 %v1016_v10 }
  0x75   : > { %872 = vmatprep.subr.bf16.mxu0 %v1215_v0  ;;  %892 = vmatprep.subr.bf16.mxu1 %v1215_v0 }
  0x78   : > { %873 = vmatpush3.bf16.msra.mxu0 %v1009_v7  ;;  %893 = vmatpush3.bf16.msra.mxu1 %v1017_v12 }
  0x79   : > { %874 = vmatprep.subr.bf16.mxu0 %v1215_v0  ;;  %894 = vmatprep.subr.bf16.mxu1 %v1215_v0 }
  0x7c   : > { %875 = vmatpush3.bf16.msra.mxu0 %v1010_v9  ;;  %895 = vmatpush3.bf16.msra.mxu1 %v1018_v15 }
  0x7d   : > { %876 = vmatprep.subr.bf16.mxu0 %v1215_v0  ;;  %896 = vmatprep.subr.bf16.mxu1 %v1215_v0 }
  0x80   : > { %877 = vmatpush3.bf16.msra.mxu0 %v1011_v11  ;;  %897 = vmatpush3.bf16.msra.mxu1 %v1019_v17 }
  0x81   : > { %878 = vmatprep.subr.bf16.mxu0 %v1215_v0  ;;  %898 = vmatprep.subr.bf16.mxu1 %v1215_v0 }
  0x84   : > { %879 = vmatpush3.bf16.msra.mxu0 %v1012_v13  ;;  %899 = vmatpush3.bf16.msra.mxu1 %v1020_v18 }
  0x85   : > { %904 = vmatprep.subr.bf16.mxu0 %v1215_v0 }
  0x87   : > { %881 = vmatmul.mubr.bf16.vlgmr.msra.gmra.mxu0 %v357_v16 }
  0x88   : > { %920 = vmatprep.mubr.msk.bf16.mxu0 %vm1216_vm0, %v1215_v0  ;;  %905 = vmatpush3.bf16.msra.mxu0 %v1021_v19 }
  0x89   : > { %906 = vmatprep.subr.bf16.mxu0 %v1215_v0 }
  0x8c   : > { %907 = vmatpush3.bf16.msra.mxu0 %v1022_v20 }
  0x8d   : > { %908 = vmatprep.subr.bf16.mxu0 %v1215_v0 }
  0x90   : > { %909 = vmatpush3.bf16.msra.mxu0 %v1023_v21 }
  0x91   : > { %910 = vmatprep.subr.bf16.mxu0 %v1215_v0 }
  0x94   : > { %911 = vmatpush3.bf16.msra.mxu0 %v1024_v22 }
  0x95   : > { %912 = vmatprep.subr.bf16.mxu0 %v1215_v0 }
  0x98   : > { %913 = vmatpush3.bf16.msra.mxu0 %v1025_v23 }
  0x99   : > { %914 = vmatprep.subr.bf16.mxu0 %v1215_v0 }
  0x9c   : > { %915 = vmatpush3.bf16.msra.mxu0 %v1026_v24 }
  0x9d   : > { %916 = vmatprep.subr.bf16.mxu0 %v1215_v0 }
  0xa0   : > { %917 = vmatpush3.bf16.msra.mxu0 %v1027_v33 }
  0xa1   : > { %918 = vmatprep.subr.bf16.mxu0 %v1215_v0 }
  0xa4   : > { %919 = vmatpush3.bf16.msra.mxu0 %v1028_v34 }
 0x147   : > { %v446_v26 = vpop.f32.mrf.mxu0 }
 0x148   : > { %v447_v27 = vadd.f32 %v806_v25, %v446_v26 }
 0x149   : > { %v882_v28 = vpop.f32.mrf.mxu0 }
 0x14a   : > { %v452_v29 = vmax.f32 %v447_v27, 0.0 }
 0x14b   : > { %v449_v30 = vpop.f32.mrf.mxu0 }
 0x14c   : > { %v470_v31 = vpack.c.bf16 %v452_v29, %v452_v29 }
 0x14d   : > { %v883_v32 = vpop.f32.mrf.mxu0 }
 0x14e   : > { %901 = vmatmul.mubr.bf16.vlgmr.msra.gmra.mxu1 %v470_v31 }
 0x20e   : > { %v559_v36 = vpop.f32.mrf.mxu1 }
 0x20f   : > { %v560_v37 = vadd.f32 %v815_v35, %v559_v36 }
 0x210   : > { %v902_v38 = vpop.f32.mrf.mxu1 }
 0x211   : > { %v565_v39 = vmax.f32 %v560_v37, 0.0 }
 0x212   : > { %v562_v40 = vpop.f32.mrf.mxu1 }
 0x213   : > { %v583_v41 = vpack.c.bf16 %v565_v39, %v565_v39 }
 0x214   : > { %v903_v42 = vpop.f32.mrf.mxu1 }
 0x215   : > { %921 = vmatmul.mubr.bf16.vlgmr.msra.gmra.mxu0 %v583_v41 }
 0x2d5   : > { %v672_v44 = vpop.f32.mrf.mxu0 }
 0x2d6   : > { %v673_v45 = vadd.f32 %v824_v43, %v672_v44 }
 0x2d7   : > { %v922_v46 = vpop.f32.mrf.mxu0 }
 0x2d8   : > { %678 = vst [vmem:[%s337_s18] sm:$0xff] %v673_v45 }
 0x2d9   : > { %v675_v47 = vpop.f32.mrf.mxu0 }
 0x2da   : > { %1148 = shalt.err (!%p1145_p9)
}
 0x2db   : > { %s1149_s9 = scalar_lea.hbm %s1450_s21, 128  ;;  %s1153_s10 = scalar_lea.hbm %s1500_s7, 256 }
 0x2dc   : > { %p1150_p13 = scmp.ne.s32.totalorder %s1450_s21, %s1149_s9  ;;  %p1154_p11 = scmp.lt.s32.totalorder %s1450_s21, %s1500_s7 }
 0x2dd   : > { %p1155_p1 = scmp.lt.s32.totalorder %s1153_s10, %s1149_s9 }
 0x2de   : > { %p1151_p8 = pnand %p1150_p13, %p1522_p6 }
 0x2df   : > { %p1156_p2 = por %p1155_p1, %p1154_p11 }
 0x2e0   : > { %p1152_p10 = pneg %p1151_p8 }
 0x2e2   : > { %p1157_p4 = pnand %p1156_p2, %p1152_p10 }
 0x2e4   : > { %1160 = shalt.err (!%p1157_p4)
}
 0x2e5   : > { %938 = dma.vmem_to_hbm [thread:$0]  (%p1522_p6), %s1452_s19, 128, %s1450_s21, %s680_s1   ;;  %v923_v48 = vpop.f32.mrf.mxu0 }
 0x2e6 PF: > { %s705_s22 = sand.u32 1, %s1195_s24   ;;  %p1523_p12 = scmp.ne.s32.totalorder %s1508_s8, 0 }
 0x2e7   : > { %p1524_p0 = scmp.ge.s32.totalorder %s1207_s27, 2  ;;  %s706_s18 = scalar_lea.sflag [#allocation4], %s705_s22 }
 0x2e9   : > { %p955_p5 = pnand %p1524_p0, %p1523_p12 }
 0x2eb   : > { %p956_p3 = pneg %p955_p5 }
 0x2ed   : > { %1190 = dma.done.wait (%p956_p3), %s706_s18, 128  }
 0x2ee   : > { %1192 = vsyncadd (%p956_p3), %s706_s18, 4294967168  ;;  %p22_p7 = scmp.ge.s32.totalorder %s1338_s14, 4   ;;  %s1525_s24 = smov %s1199_s25 }
 0x2ef   : > { %s1526_s25 = smov %s1203_s26  ;;  %s1527_s26 = smov %s1348_s17 }
 0x2f0   : > { %s1528_s27 = smov %s1338_s14  ;;  %24 = sbr.rel (!%p22_p7) target bundleno = 10 (0xa), region = 105 }
 0x2f5   :  { %711 = vsyncpa [#allocation3], 1 }
 0x2f6   :  { %713 = vsyncpa [#allocation3 + $0x1], 1 }
 0x2f7   :  { %714 = vsyncpa [#allocation6], 1 }
 0x2f8   :  { %715 = vsyncpa [#allocation9], 1 }
 0x2f9   :  { %716 = vsyncpa [#allocation4], 1 }
 0x2fa   :  { %718 = vsyncpa [#allocation4 + $0x1], 1 }

// kernel: tpu_custom_call.1
= control target key start
LH: loop header
LB: loop body
LE: loop exit
PB: predicated region body
PF: predicated region fallthrough
CT: control target
= control target key end

     0   :  { %s1493_s0 = inlined_call_operand.hbm [shape: f32[16,128], index: 0, kind: input, shape index: {}]   ;;  %s1494_s1 = inlined_call_operand.hbm [shape: bf16[128,128], index: 1, kind: input, shape index: {}]   ;;  %s1495_s2 = inlined_call_operand.vmem [shape: f32[1,128], index: 2, kind: input, shape index: {}]   ;;  %s1496_s3 = inlined_call_operand.hbm [shape: bf16[128,128], index: 3, kind: input, shape index: {}]   ;;  %s1497_s4 = inlined_call_operand.vmem [shape: f32[1,128], index: 4, kind: input, shape index: {}]   ;;  %s1498_s5 = inlined_call_operand.hbm [shape: bf16[128,128], index: 5, kind: input, shape index: {}]   ;;  %s1499_s6 = inlined_call_operand.vmem [shape: f32[1,128], index: 6, kind: input, shape index: {}]   ;;  %s1500_s7 = inlined_call_operand.hbm [shape: f32[16,128], index: 7, kind: output, shape index: {}]  }
   0x1   :  { %1505 = sst [smem:[#allocation15_spill]] %s1494_s1 }
   0x2   :  { %1506 = sst [smem:[#allocation16_spill]] %s1496_s3 }
   0x3   :  { %12 = vsyncpa [#allocation3], 0 }
   0x4   :  { %14 = vsyncpa [#allocation3 + $0x1], 0 }
   0x5   :  { %15 = vsyncpa [#allocation6], 0 }
   0x6   :  { %16 = vsyncpa [#allocation9], 0 }
   0x7   :  { %17 = vsyncpa [#allocation4], 0 }
   0x8   :  { %19 = vsyncpa [#allocation4 + $0x1], 0  ;;  %s1258_s24 = smov 0   ;;  %s1260_s25 = smov 0  }
   0x9   :  { %s1262_s26 = smov 0   ;;  %s1264_s27 = smov 0  }
   0xa LB: > { %s1279_s28 = sadd.s32 4294967295, %s1207_s27   ;;  %s792_s29 = sadd.s32 4294967294, %s1207_s27   ;;  %s1207_s27 = sphi %s1264_s27, %s1528_s27   ;;  %s1203_s26 = sphi %s1262_s26, %s1527_s26   ;;  %s1199_s25 = sphi %s1260_s25, %s1526_s25   ;;  %s1195_s24 = sphi %s1258_s24, %s1525_s24  }
   0xb   : > { %p45_p0 = scmp.ne.s32.totalorder %s1199_s25, %s1195_s24  ;;  %p1501_p1 = scmp.eq.s32.totalorder %s1279_s28, 0 }
   0xc   : > { %p201_p3 = scmp.eq.s32.totalorder %s792_s29, 1  ;;  %p793_p5 = scmp.ge.s32.totalorder %s1207_s27, 1 }
   0xd   : > { %p1288_p4 = por %p1501_p1, %p45_p0  ;;  %p208_p7 = scmp.lt.s32.totalorder %s1207_s27, 3 }
   0xe   : > { %p1293_p6 = por %p201_p3, %p45_p0  ;;  %s1209_s10 = smov [#allocation5]  }
   0xf   : > { %s1507_s30 = scalar_select %p1288_p4, 1, 0 }
  0x10   : > { %s1508_s8 = scalar_select %p1293_p6, 1, 0 }
  0x11   : > { %p1298_p8 = pnand %p793_p5, %p208_p7  ;;  %s220_s11 = sshll.u32 %s1209_s10, 4  ;;  %s221_s11 = int_to_ptr.vmem [resolvable:$true] %s220_s11 }
  0x12   : > { %s1210_s13 = smov [#allocation7]   ;;  %s1211_s15 = smov [#allocation8]  }
  0x13   : > { %s1509_s9 = scalar_select %p1298_p8, 1, 0 }
  0x14   : > { %p940_p9 = pneg %p1298_p8  ;;  %s236_s14 = sshll.u32 %s1210_s13, 4  ;;  %s237_s14 = int_to_ptr.vmem [resolvable:$true] %s236_s14 }
  0x15   : > { %s252_s16 = sshll.u32 %s1211_s15, 4  ;;  %s1040_s17 = scalar_lea.vmem %s221_s11, 1024  ;;  %s253_s16 = int_to_ptr.vmem [resolvable:$true] %s252_s16 }
  0x16   : > { %p1307_p11 = pnand %p940_p9, %p1501_p1  ;;  %p1041_p13 = scmp.ne.s32.totalorder %s221_s11, %s1040_s17 }
  0x17   : > { %p1048_p5 = scmp.lt.s32.totalorder %s221_s11, %s221_s11  ;;  %p1049_p7 = scmp.lt.s32.totalorder %s1040_s17, %s1040_s17 }
  0x18   : > { %p1031_p12 = pneg %p1307_p11 }
  0x19   : > { %p1050_p9 = por %p1049_p7, %p1048_p5 }
  0x1a   : > { %p1043_p0 = pnand %p1041_p13, %p1031_p12 }
  0x1c   : > { %p1044_p3 = pneg %p1043_p0 }
  0x1e   : > { %p1051_p10 = pnand %p1050_p9, %p1044_p3 }
  0x20   : > { %1054 = shalt.err (!%p1051_p10)
}
  0x21   : > { %s1212_s18 = smov 64   ;;  %s1213_s19 = smov 4  }
  0x22   : > { %s1511_s1 = sld [smem:[#allocation15_spill]]  ;;  %s1066_s22 = scalar_lea.vmem %s237_s14, 1024 }
  0x23   : > { %p1067_p1 = scmp.ne.s32.totalorder %s237_s14, %s1066_s22  ;;  %p1074_p2 = scmp.lt.s32.totalorder %s237_s14, %s237_s14 }
  0x24   : > { %p1075_p6 = scmp.lt.s32.totalorder %s1066_s22, %s1066_s22 }
  0x25   : > { %p1069_p13 = pnand %p1067_p1, %p1031_p12 }
  0x26   : > { %p1076_p5 = por %p1075_p6, %p1074_p2 }
  0x27   : > { %p1070_p0 = pneg %p1069_p13 }
  0x28   : > { %943 = dma.hbm_to_vmem [thread:$0]  (!%p1307_p11), %s1511_s1, 1024, %s221_s11, [#allocation6], %s1212_s18, %s1212_s18, %s1213_s19  }
  0x29   : > { %p1077_p3 = pnand %p1076_p5, %p1070_p0 }
  0x2b   : > { %1080 = shalt.err (!%p1077_p3)
}
  0x2c   : > { %s1512_s3 = sld [smem:[#allocation16_spill]]  ;;  %s1092_s10 = scalar_lea.vmem %s253_s16, 1024 }
  0x2d   : > { %p1093_p10 = scmp.ne.s32.totalorder %s253_s16, %s1092_s10  ;;  %p1100_p9 = scmp.lt.s32.totalorder %s253_s16, %s253_s16 }
  0x2e   : > { %p1101_p13 = scmp.lt.s32.totalorder %s1092_s10, %s1092_s10 }
  0x2f   : > { %p1095_p7 = pnand %p1093_p10, %p1031_p12 }
  0x30   : > { %p1102_p4 = por %p1101_p13, %p1100_p9 }
  0x31   : > { %p1096_p1 = pneg %p1095_p7 }
  0x32   : > { %946 = dma.hbm_to_vmem [thread:$0]  (!%p1307_p11), %s1512_s3, 1024, %s237_s14, [#allocation6], %s1212_s18, %s1212_s18, %s1213_s19  }
  0x33   : > { %p1103_p2 = pnand %p1102_p4, %p1096_p1 }
  0x35   : > { %1106 = shalt.err (!%p1103_p2)
}
  0x36   : > { %949 = dma.hbm_to_vmem [thread:$0]  (!%p1307_p11), %s1498_s5, 1024, %s253_s16, [#allocation9], %s1212_s18, %s1212_s18, %s1213_s19  }
  0x37   : > { %s1338_s14 = sadd.s32 1, %s1207_s27   ;;  %s32_s12 = sadd.s32 1, %s1203_s26 }
  0x38   : > { %s29_s15 = ssub.s32 %s1207_s27, %s1338_s14  ;;  %p39_p6 = scmp.ne.s32.totalorder %s1203_s26, %s1199_s25 }
  0x39   : > { %p30_p4 = scmp.eq.s32.totalorder %s29_s15, 0  ;;  %p40_p12 = scmp.eq.s32.totalorder %s1207_s27, 0 }
  0x3a   : > { %p961_p0 = scmp.lt.s32.totalorder %s1207_s27, 2  ;;  %p1513_p3 = scmp.eq.s32.totalorder %s1279_s28, 1 }
  0x3b   : > { %s1348_s17 = scalar_select %p30_p4, %s1203_s26, %s32_s12  }
  0x3c   : > { %p41_p5 = por %p40_p12, %p39_p6  ;;  %p1352_p10 = por %p1513_p3, %p39_p6 }
  0x3d   : > { %s269_s21 = sand.u32 1, %s1203_s26   ;;  %s799_s22 = sshll.u32 %s1207_s27, 7 }
  0x3e   : > { %s1514_s20 = scalar_select %p1352_p10, 1, 0 }
  0x3f   : > { %s798_s16 = sshll.u32 %s269_s21, 3  ;;  %s1361_s23 = scalar_lea.hbm %s1493_s0, %s799_s22 }
  0x40   : > { %s273_s29 = scalar_lea.vmem [#allocation2], %s798_s16  ;;  %p1363_p11 = pnand %p961_p0, %p41_p5 }
  0x41   : > { %s280_s10 = sshll.u32 %s273_s29, 4  ;;  %s270_s13 = scalar_lea.sflag [#allocation3], %s269_s21  ;;  %s281_s10 = int_to_ptr.vmem [resolvable:$true] %s280_s10 }
  0x42   : > { %s1107_s15 = scalar_lea.hbm %s1361_s23, 128  ;;  %p1109_p1 = pneg %p1363_p11 }
  0x43   : > { %p1108_p7 = scmp.ne.s32.totalorder %s1361_s23, %s1107_s15  ;;  %s1112_s18 = scalar_lea.hbm %s1493_s0, 256 }
  0x44   : > { %p1113_p2 = scmp.lt.s32.totalorder %s1361_s23, %s1493_s0  ;;  %p1114_p4 = scmp.lt.s32.totalorder %s1112_s18, %s1107_s15 }
  0x45   : > { %p1110_p9 = pnand %p1109_p1, %p1108_p7 }
  0x46   : > { %p1115_p6 = por %p1114_p4, %p1113_p2 }
  0x47   : > { %p1111_p13 = pneg %p1110_p9 }
  0x49   : > { %p1116_p12 = pnand %p1115_p6, %p1111_p13 }
  0x4b   : > { %1119 = shalt.err (!%p1116_p12)
}
  0x4c   : > { %s1120_s29 = scalar_lea.vmem %s281_s10, 128  ;;  %s1214_s21 = smov [#allocation2]  }
  0x4d   : > { %p1121_p0 = scmp.ne.s32.totalorder %s281_s10, %s1120_s29  ;;  %s1125_s1 = sshll.u32 %s1214_s21, 4  ;;  %s1126_s1 = int_to_ptr.vmem [resolvable:$false] %s1125_s1 }
  0x4e   : > { %s1127_s3 = scalar_lea.vmem %s1126_s1, 256  ;;  %p1128_p7 = scmp.lt.s32.totalorder %s281_s10, %s1126_s1 }
  0x4f   : > { %p1123_p5 = pnand %p1121_p0, %p1109_p1  ;;  %p1129_p9 = scmp.lt.s32.totalorder %s1127_s3, %s1120_s29 }
  0x51   : > { %p1124_p3 = pneg %p1123_p5  ;;  %p1130_p10 = por %p1129_p9, %p1128_p7 }
  0x53   : > { %p1131_p8 = pnand %p1130_p10, %p1124_p3 }
  0x55   : > { %1134 = shalt.err (!%p1131_p8)
}
  0x56   : > { %953 = dma.hbm_to_vmem [thread:$0]  (!%p1363_p11), %s1361_s23, 128, %s281_s10, %s270_s13  }
  0x57   : > { %p1516_p13 = scmp.ne.s32.totalorder %s1509_s9, 0 }
  0x58   : > { %s1384_s15 = sand.u32 (!%p1516_p13), 1, %s1199_s25   ;;  %p1517_p8 = scmp.ne.s32.totalorder (!%p1516_p13), %s1507_s30, 0 }
  0x59   : > { %289 = sbr.rel (%p1516_p13) target bundleno = 742 (0x2e6), region = 48  ;;  %s801_s12 = sshll.u32 (!%p1516_p13), %s1384_s15, 3 }
  0x5a   : > { %s292_s1 = scalar_lea.sflag (!%p1516_p13), [#allocation3], %s1384_s15  ;;  %s1390_s3 = scalar_lea.vmem (!%p1516_p13), [#allocation2], %s801_s12 }
  0x5e   : > { %1178 = dma.done.wait (%p1517_p8), %s292_s1, 128  }
  0x5f   : > { %1180 = vsyncadd (%p1517_p8), %s292_s1, 4294967168  ;;  %p1518_p10 = scmp.eq.s32.totalorder %s1279_s28, 0 }
  0x61   : > { %1182 = dma.done.wait (%p1518_p10), [#allocation6], 2048   ;;  %p1519_p11 = pmov %p1518_p10 }
  0x62   : > { %p1520_p1 = pmov %p1518_p10 }
  0x63   : > { %1184 = vsyncadd (%p1519_p11), [#allocation6], 4294965248 }
  0x64   : > { %1186 = dma.done.wait (%p1520_p1), [#allocation9], 1024   ;;  %p1521_p2 = pmov %p1520_p1 }
  0x65   : > { %v1215_v0 = vmov 0.0   ;;  %vm1216_vm0 = vmmov 0   ;;  %v1005_v1 = vld [vmem:[#allocation5 + $0x38] sm:$0xff]   ;;  %v1006_v2 = vld [vmem:[#allocation5 + $0x30] sm:$0xff]   ;;  %v1007_v3 = vld [vmem:[#allocation5 + $0x28] sm:$0xff]   ;;  %s834_s22 = sshll.u32 %s1279_s28, 7 }
  0x66   : > { %1188 = vsyncadd (%p1521_p2), [#allocation9], 4294966272  ;;  %864 = vmatprep.subr.bf16.mxu0 %v1215_v0  ;;  %880 = vmatprep.mubr.msk.bf16.mxu0 %vm1216_vm0, %v1215_v0  ;;  %v1013_v4 = vld [vmem:[#allocation7 + $0x38] sm:$0xff]   ;;  %v1008_v5 = vld [vmem:[#allocation5 + $0x20] sm:$0xff]   ;;  %s337_s18 = scalar_lea.vmem [#allocation10], %s801_s12  ;;  %s1450_s21 = scalar_lea.hbm %s1500_s7, %s834_s22 }
  0x67   : > { %884 = vmatprep.subr.bf16.mxu1 %v1215_v0  ;;  %900 = vmatprep.mubr.msk.bf16.mxu1 %vm1216_vm0, %v1215_v0  ;;  %v1014_v6 = vld [vmem:[#allocation7 + $0x30] sm:$0xff]   ;;  %v1009_v7 = vld [vmem:[#allocation5 + $0x18] sm:$0xff]   ;;  %v1015_v8 = vld [vmem:[#allocation7 + $0x28] sm:$0xff]   ;;  %s693_s19 = sshll.u32 %s337_s18, 4  ;;  %s680_s1 = scalar_lea.sflag [#allocation4], %s1384_s15  ;;  %s1452_s19 = int_to_ptr.vmem [resolvable:$true] %s693_s19 }
  0x68   : > { %865 = vmatpush3.bf16.msra.mxu0 %v1005_v1  ;;  %885 = vmatpush3.bf16.msra.mxu1 %v1013_v4  ;;  %v1010_v9 = vld [vmem:[#allocation5 + $0x10] sm:$0xff]   ;;  %v1016_v10 = vld [vmem:[#allocation7 + $0x20] sm:$0xff]   ;;  %v1011_v11 = vld [vmem:[#allocation5 + $0x8] sm:$0xff]   ;;  %s1135_s28 = scalar_lea.vmem %s1452_s19, 128  ;;  %p1522_p6 = scmp.ne.s32.totalorder %s1514_s20, 0 }
  0x69   : > { %866 = vmatprep.subr.bf16.mxu0 %v1215_v0  ;;  %886 = vmatprep.subr.bf16.mxu1 %v1215_v0  ;;  %v1017_v12 = vld [vmem:[#allocation7 + $0x18] sm:$0xff]   ;;  %v1012_v13 = vld [vmem:[#allocation5] sm:$0xff]   ;;  %v1018_v15 = vld [vmem:[#allocation7 + $0x10] sm:$0xff]   ;;  %p1136_p4 = scmp.ne.s32.totalorder %s1452_s19, %s1135_s28  ;;  %s1217_s12 = smov [#allocation10]  }
  0x6a   : > { %v339_v14 = vld [vmem:[%s1390_s3] sm:$0xff]  ;;  %v1019_v17 = vld [vmem:[#allocation7 + $0x8] sm:$0xff]   ;;  %v1020_v18 = vld [vmem:[#allocation7] sm:$0xff]   ;;  %s1139_s3 = sshll.u32 %s1217_s12, 4  ;;  %s1140_s3 = int_to_ptr.vmem [resolvable:$false] %s1139_s3 }
  0x6b   : > { %v357_v16 = vpack.c.bf16 %v339_v14, %v339_v14  ;;  %v1021_v19 = vld [vmem:[#allocation8 + $0x38] sm:$0xff]   ;;  %v1022_v20 = vld [vmem:[#allocation8 + $0x30] sm:$0xff]   ;;  %v1023_v21 = vld [vmem:[#allocation8 + $0x28] sm:$0xff]   ;;  %p1137_p12 = pnand %p1136_p4, %p1522_p6  ;;  %s1141_s30 = scalar_lea.vmem %s1140_s3, 256 }
  0x6c   : > { %867 = vmatpush3.bf16.msra.mxu0 %v1006_v2  ;;  %887 = vmatpush3.bf16.msra.mxu1 %v1014_v6  ;;  %v1024_v22 = vld [vmem:[#allocation8 + $0x20] sm:$0xff]   ;;  %v1025_v23 = vld [vmem:[#allocation8 + $0x18] sm:$0xff]   ;;  %v1026_v24 = vld [vmem:[#allocation8 + $0x10] sm:$0xff]   ;;  %p1142_p5 = scmp.lt.s32.totalorder %s1452_s19, %s1140_s3  ;;  %p1143_p3 = scmp.lt.s32.totalorder %s1141_s30, %s1135_s28 }
  0x6d   : > { %868 = vmatprep.subr.bf16.mxu0 %v1215_v0  ;;  %888 = vmatprep.subr.bf16.mxu1 %v1215_v0  ;;  %v806_v25 = vld [vmem:[%s1495_s2] ss:$0 sm:$0xff]  ;;  %v1027_v33 = vld [vmem:[#allocation8 + $0x8] sm:$0xff]   ;;  %v1028_v34 = vld [vmem:[#allocation8] sm:$0xff]   ;;  %p1138_p0 = pneg %p1137_p12 }
  0x6e   : > { %v815_v35 = vld [vmem:[%s1497_s4] ss:$0 sm:$0xff]  ;;  %p1144_p7 = por %p1143_p3, %p1142_p5 }
  0x6f   : > { %v824_v43 = vld [vmem:[%s1499_s6] ss:$0 sm:$0xff] }
  0x70   : > { %869 = vmatpush3.bf16.msra.mxu0 %v1007_v3  ;;  %889 = vmatpush3.bf16.msra.mxu1 %v1015_v8  ;;  %p1145_p9 = pnand %p1144_p7, %p1138_p0 }
  0x71   : > { %870 = vmatprep.subr.bf16.mxu0 %v1215_v0  ;;  %890 = vmatprep.subr.bf16.mxu1 %v1215_v0 }
  0x74   : > { %871 = vmatpush3.bf16.msra.mxu0 %v1008_v5  ;;  %891 = vmatpush3.bf16.msra.mxu1 %v1016_v10 }
  0x75   : > { %872 = vmatprep.subr.bf16.mxu0 %v1215_v0  ;;  %892 = vmatprep.subr.bf16.mxu1 %v1215_v0 }
  0x78   : > { %873 = vmatpush3.bf16.msra.mxu0 %v1009_v7  ;;  %893 = vmatpush3.bf16.msra.mxu1 %v1017_v12 }
  0x79   : > { %874 = vmatprep.subr.bf16.mxu0 %v1215_v0  ;;  %894 = vmatprep.subr.bf16.mxu1 %v1215_v0 }
  0x7c   : > { %875 = vmatpush3.bf16.msra.mxu0 %v1010_v9  ;;  %895 = vmatpush3.bf16.msra.mxu1 %v1018_v15 }
  0x7d   : > { %876 = vmatprep.subr.bf16.mxu0 %v1215_v0  ;;  %896 = vmatprep.subr.bf16.mxu1 %v1215_v0 }
  0x80   : > { %877 = vmatpush3.bf16.msra.mxu0 %v1011_v11  ;;  %897 = vmatpush3.bf16.msra.mxu1 %v1019_v17 }
  0x81   : > { %878 = vmatprep.subr.bf16.mxu0 %v1215_v0  ;;  %898 = vmatprep.subr.bf16.mxu1 %v1215_v0 }
  0x84   : > { %879 = vmatpush3.bf16.msra.mxu0 %v1012_v13  ;;  %899 = vmatpush3.bf16.msra.mxu1 %v1020_v18 }
  0x85   : > { %904 = vmatprep.subr.bf16.mxu0 %v1215_v0 }
  0x87   : > { %881 = vmatmul.mubr.bf16.vlgmr.msra.gmra.mxu0 %v357_v16 }
  0x88   : > { %920 = vmatprep.mubr.msk.bf16.mxu0 %vm1216_vm0, %v1215_v0  ;;  %905 = vmatpush3.bf16.msra.mxu0 %v1021_v19 }
  0x89   : > { %906 = vmatprep.subr.bf16.mxu0 %v1215_v0 }
  0x8c   : > { %907 = vmatpush3.bf16.msra.mxu0 %v1022_v20 }
  0x8d   : > { %908 = vmatprep.subr.bf16.mxu0 %v1215_v0 }
  0x90   : > { %909 = vmatpush3.bf16.msra.mxu0 %v1023_v21 }
  0x91   : > { %910 = vmatprep.subr.bf16.mxu0 %v1215_v0 }
  0x94   : > { %911 = vmatpush3.bf16.msra.mxu0 %v1024_v22 }
  0x95   : > { %912 = vmatprep.subr.bf16.mxu0 %v1215_v0 }
  0x98   : > { %913 = vmatpush3.bf16.msra.mxu0 %v1025_v23 }
  0x99   : > { %914 = vmatprep.subr.bf16.mxu0 %v1215_v0 }
  0x9c   : > { %915 = vmatpush3.bf16.msra.mxu0 %v1026_v24 }
  0x9d   : > { %916 = vmatprep.subr.bf16.mxu0 %v1215_v0 }
  0xa0   : > { %917 = vmatpush3.bf16.msra.mxu0 %v1027_v33 }
  0xa1   : > { %918 = vmatprep.subr.bf16.mxu0 %v1215_v0 }
  0xa4   : > { %919 = vmatpush3.bf16.msra.mxu0 %v1028_v34 }
 0x147   : > { %v446_v26 = vpop.f32.mrf.mxu0 }
 0x148   : > { %v447_v27 = vadd.f32 %v806_v25, %v446_v26 }
 0x149   : > { %v882_v28 = vpop.f32.mrf.mxu0 }
 0x14a   : > { %v452_v29 = vmax.f32 %v447_v27, 0.0 }
 0x14b   : > { %v449_v30 = vpop.f32.mrf.mxu0 }
 0x14c   : > { %v470_v31 = vpack.c.bf16 %v452_v29, %v452_v29 }
 0x14d   : > { %v883_v32 = vpop.f32.mrf.mxu0 }
 0x14e   : > { %901 = vmatmul.mubr.bf16.vlgmr.msra.gmra.mxu1 %v470_v31 }
 0x20e   : > { %v559_v36 = vpop.f32.mrf.mxu1 }
 0x20f   : > { %v560_v37 = vadd.f32 %v815_v35, %v559_v36 }
 0x210   : > { %v902_v38 = vpop.f32.mrf.mxu1 }
 0x211   : > { %v565_v39 = vmax.f32 %v560_v37, 0.0 }
 0x212   : > { %v562_v40 = vpop.f32.mrf.mxu1 }
 0x213   : > { %v583_v41 = vpack.c.bf16 %v565_v39, %v565_v39 }
 0x214   : > { %v903_v42 = vpop.f32.mrf.mxu1 }
 0x215   : > { %921 = vmatmul.mubr.bf16.vlgmr.msra.gmra.mxu0 %v583_v41 }
 0x2d5   : > { %v672_v44 = vpop.f32.mrf.mxu0 }
 0x2d6   : > { %v673_v45 = vadd.f32 %v824_v43, %v672_v44 }
 0x2d7   : > { %v922_v46 = vpop.f32.mrf.mxu0 }
 0x2d8   : > { %678 = vst [vmem:[%s337_s18] sm:$0xff] %v673_v45 }
 0x2d9   : > { %v675_v47 = vpop.f32.mrf.mxu0 }
 0x2da   : > { %1148 = shalt.err (!%p1145_p9)
}
 0x2db   : > { %s1149_s9 = scalar_lea.hbm %s1450_s21, 128  ;;  %s1153_s10 = scalar_lea.hbm %s1500_s7, 256 }
 0x2dc   : > { %p1150_p13 = scmp.ne.s32.totalorder %s1450_s21, %s1149_s9  ;;  %p1154_p11 = scmp.lt.s32.totalorder %s1450_s21, %s1500_s7 }
 0x2dd   : > { %p1155_p1 = scmp.lt.s32.totalorder %s1153_s10, %s1149_s9 }
 0x2de   : > { %p1151_p8 = pnand %p1150_p13, %p1522_p6 }
 0x2df   : > { %p1156_p2 = por %p1155_p1, %p1154_p11 }
 0x2e0   : > { %p1152_p10 = pneg %p1151_p8 }
 0x2e2   : > { %p1157_p4 = pnand %p1156_p2, %p1152_p10 }
 0x2e4   : > { %1160 = shalt.err (!%p1157_p4)
}
 0x2e5   : > { %938 = dma.vmem_to_hbm [thread:$0]  (%p1522_p6), %s1452_s19, 128, %s1450_s21, %s680_s1   ;;  %v923_v48 = vpop.f32.mrf.mxu0 }
 0x2e6 PF: > { %s705_s22 = sand.u32 1, %s1195_s24   ;;  %p1523_p12 = scmp.ne.s32.totalorder %s1508_s8, 0 }
 0x2e7   : > { %p1524_p0 = scmp.ge.s32.totalorder %s1207_s27, 2  ;;  %s706_s18 = scalar_lea.sflag [#allocation4], %s705_s22 }
 0x2e9   : > { %p955_p5 = pnand %p1524_p0, %p1523_p12 }
 0x2eb   : > { %p956_p3 = pneg %p955_p5 }
 0x2ed   : > { %1190 = dma.done.wait (%p956_p3), %s706_s18, 128  }
 0x2ee   : > { %1192 = vsyncadd (%p956_p3), %s706_s18, 4294967168  ;;  %p22_p7 = scmp.ge.s32.totalorder %s1338_s14, 4   ;;  %s1525_s24 = smov %s1199_s25 }
 0x2ef   : > { %s1526_s25 = smov %s1203_s26  ;;  %s1527_s26 = smov %s1348_s17 }
 0x2f0   : > { %s1528_s27 = smov %s1338_s14  ;;  %24 = sbr.rel (!%p22_p7) target bundleno = 10 (0xa), region = 105 }
 0x2f5   :  { %711 = vsyncpa [#allocation3], 1 }
 0x2f6   :  { %713 = vsyncpa [#allocation3 + $0x1], 1 }
 0x2f7   :  { %714 = vsyncpa [#allocation6], 1 }
 0x2f8   :  { %715 = vsyncpa [#allocation9], 1 }
 0x2f9   :  { %716 = vsyncpa [#allocation4], 1 }
 0x2fa   :  { %718 = vsyncpa [#allocation4 + $0x1], 1 }

// kernel: tpu_custom_call.1
= control target key start
LH: loop header
LB: loop body
LE: loop exit
PB: predicated region body
PF: predicated region fallthrough
CT: control target
= control target key end

     0   :  { %8 = vsyncpa [#allocation4], 0  ;;  %s368_s0 = inlined_call_operand.hbm [shape: f32[16,128], index: 0, kind: input, shape index: {}]   ;;  %s369_s1 = inlined_call_operand.hbm [shape: bf16[128,128], index: 1, kind: input, shape index: {}]   ;;  %s370_s2 = inlined_call_operand.vmem [shape: f32[1,128], index: 2, kind: input, shape index: {}]   ;;  %s371_s3 = inlined_call_operand.hbm [shape: f32[16,128], index: 3, kind: output, shape index: {}]  }
   0x1   :  { %9 = vsyncpa [#allocation7], 0 }
   0x2   :  { %10 = vsyncpa [#allocation5], 0  ;;  %s321_s12 = smov [#allocation3]  }
   0x3   :  { %s16_s13 = sshll.u32 %s321_s12, 4  ;;  %s17_s13 = int_to_ptr.vmem [resolvable:$true] %s16_s13 }
   0x4   :  { %s263_s14 = scalar_lea.vmem %s17_s13, 256  ;;  %p268_p1 = scmp.lt.s32.totalorder %s17_s13, %s17_s13 }
   0x5   :  { %p264_p0 = scmp.ne.s32.totalorder %s17_s13, %s263_s14  ;;  %p269_p2 = scmp.lt.s32.totalorder %s263_s14, %s263_s14 }
   0x7   :  { %p270_p3 = por %p269_p2, %p268_p1 }
   0x9   :  { %p271_p4 = pnand %p270_p3, %p264_p0 }
   0xb   :  { %274 = shalt.err (!%p271_p4)
}
   0xc   :  { %s322_s15 = smov 128   ;;  %s323_s16 = smov 8  }
   0xd   :  { %22 = dma.hbm_to_vmem [thread:$0]  %s368_s0, 256, %s17_s13, [#allocation4], %s322_s15, %s322_s15, %s323_s16  }
   0xe   :  { %s324_s19 = smov [#allocation6]  }
   0xf   :  { %s28_s20 = sshll.u32 %s324_s19, 4  ;;  %s29_s20 = int_to_ptr.vmem [resolvable:$true] %s28_s20 }
  0x10   :  { %s283_s21 = scalar_lea.vmem %s29_s20, 1024  ;;  %p288_p6 = scmp.lt.s32.totalorder %s29_s20, %s29_s20 }
  0x11   :  { %p284_p5 = scmp.ne.s32.totalorder %s29_s20, %s283_s21  ;;  %p289_p7 = scmp.lt.s32.totalorder %s283_s21, %s283_s21 }
  0x13   :  { %p290_p8 = por %p289_p7, %p288_p6 }
  0x15   :  { %p291_p9 = pnand %p290_p8, %p284_p5 }
  0x17   :  { %294 = shalt.err (!%p291_p9)
}
  0x18   :  { %s325_s22 = smov 64   ;;  %s326_s23 = smov 4  }
  0x19   :  { %34 = dma.hbm_to_vmem [thread:$0]  %s369_s1, 1024, %s29_s20, [#allocation7], %s325_s22, %s325_s22, %s326_s23  }
  0x1a   :  { %315 = dma.done.wait [#allocation4], 256  }
  0x1b   :  { %316 = vsyncadd [#allocation4], 4294967040 }
  0x1c   :  { %317 = dma.done.wait [#allocation7], 1024  }
  0x1d   :  { %318 = vsyncadd [#allocation7], 4294966272  ;;  %v327_v0 = vmov 0.0   ;;  %vm328_vm0 = vmmov 0   ;;  %v247_v1 = vld [vmem:[#allocation6 + $0x38] sm:$0xff]   ;;  %v248_v2 = vld [vmem:[#allocation6 + $0x30] sm:$0xff]  }
  0x1e   :  { %218 = vmatprep.subr.bf16.mxu0 %v327_v0  ;;  %234 = vmatprep.mubr.msk.bf16.mxu0 %vm328_vm0, %v327_v0  ;;  %v249_v3 = vld [vmem:[#allocation6 + $0x28] sm:$0xff]   ;;  %v250_v4 = vld [vmem:[#allocation6 + $0x20] sm:$0xff]   ;;  %v251_v5 = vld [vmem:[#allocation6 + $0x18] sm:$0xff]   ;;  %s329_s26 = smov [#allocation8]  }
  0x1f   :  { %219 = vmatpush3.bf16.msra.mxu0 %v247_v1  ;;  %v252_v6 = vld [vmem:[#allocation6 + $0x10] sm:$0xff]   ;;  %v253_v7 = vld [vmem:[#allocation6 + $0x8] sm:$0xff]   ;;  %v254_v8 = vld [vmem:[#allocation6] sm:$0xff]   ;;  %s187_s27 = sshll.u32 %s329_s26, 4  ;;  %s188_s27 = int_to_ptr.vmem [resolvable:$true] %s187_s27 }
  0x20   :  { %220 = vmatprep.subr.bf16.mxu0 %v327_v0  ;;  %v52_v9 = vld [vmem:[#allocation3] sm:$0xff]  ;;  %v53_v10 = vld [vmem:[#allocation3 + $0x8] sm:$0xff]  ;;  %s295_s28 = scalar_lea.vmem %s188_s27, 256  ;;  %p300_p11 = scmp.lt.s32.totalorder %s188_s27, %s188_s27 }
  0x21   :  { %v54_v11 = vpack.c.bf16 %v53_v10, %v52_v9  ;;  %v208_v12 = vld [vmem:[%s370_s2] ss:$0 sm:$0xff]  ;;  %p296_p10 = scmp.ne.s32.totalorder %s188_s27, %s295_s28  ;;  %p301_p12 = scmp.lt.s32.totalorder %s295_s28, %s295_s28 }
  0x23   :  { %221 = vmatpush3.bf16.msra.mxu0 %v248_v2  ;;  %p302_p13 = por %p301_p12, %p300_p11 }
  0x24   :  { %222 = vmatprep.subr.bf16.mxu0 %v327_v0 }
  0x25   :  { %p303_p0 = pnand %p302_p13, %p296_p10 }
  0x27   :  { %223 = vmatpush3.bf16.msra.mxu0 %v249_v3 }
  0x28   :  { %224 = vmatprep.subr.bf16.mxu0 %v327_v0 }
  0x2b   :  { %225 = vmatpush3.bf16.msra.mxu0 %v250_v4 }
  0x2c   :  { %226 = vmatprep.subr.bf16.mxu0 %v327_v0 }
  0x2f   :  { %227 = vmatpush3.bf16.msra.mxu0 %v251_v5 }
  0x30   :  { %228 = vmatprep.subr.bf16.mxu0 %v327_v0 }
  0x33   :  { %229 = vmatpush3.bf16.msra.mxu0 %v252_v6 }
  0x34   :  { %230 = vmatprep.subr.bf16.mxu0 %v327_v0 }
  0x37   :  { %231 = vmatpush3.bf16.msra.mxu0 %v253_v7 }
  0x38   :  { %232 = vmatprep.subr.bf16.mxu0 %v327_v0 }
  0x3b   :  { %233 = vmatpush3.bf16.msra.mxu0 %v254_v8 }
  0x3e   :  { %235 = vmatmul.mubr.bf16.vlgmr.msra.gmra.mxu0 %v54_v11 }
  0xfe   :  { %v153_v13 = vpop.f32.mrf.mxu0 }
  0xff   :  { %v176_v14 = vadd.f32 %v208_v12, %v153_v13 }
 0x100   :  { %v236_v15 = vpop.f32.mrf.mxu0 }
 0x101   :  { %v178_v16 = vmax.f32 %v176_v14, 0.0 }
 0x102   :  { %v156_v17 = vpop.f32.mrf.mxu0 }
 0x103   :  { %180 = vst [vmem:[#allocation8] sm:$0xff] %v178_v16  ;;  %v177_v18 = vadd.f32 %v208_v12, %v156_v17 }
 0x104   :  { %v237_v19 = vpop.f32.mrf.mxu0 }
 0x105   :  { %v179_v20 = vmax.f32 %v177_v18, 0.0 }
 0x107   :  { %181 = vst [vmem:[#allocation8 + $0x8] sm:$0xff] %v179_v20 }
 0x108   :  { %306 = shalt.err (!%p303_p0)
}
 0x109   :  { %193 = dma.vmem_to_hbm [thread:$0]  %s188_s27, 256, %s371_s3, [#allocation5], %s322_s15, %s322_s15, %s323_s16  }
 0x10a   :  { %319 = dma.done.wait [#allocation5], 256  }
 0x10b   :  { %320 = vsyncadd [#allocation5], 4294967040 }
 0x10c   :  { %197 = vsyncpa [#allocation4], 1 }
 0x10d   :  { %198 = vsyncpa [#allocation7], 1 }
 0x10e   :  { %199 = vsyncpa [#allocation5], 1 }

</bundles_post_ra>
